<compile_context>
chip_gen: v5e
topology: v5e:2x2
jax: 0.10.0
libtpu: 0.0.40
codegen_flags: <defaults>
</compile_context>

<pallas_src>
import functools

import jax
import jax.numpy as jnp
import numpy as np
from jax import lax
from jax.experimental import pallas as pl
from jax.experimental.pallas import tpu as pltpu

_LN_EPS = 1e-5


def _device_defaults():
    """Per-generation knobs: (vmem_limit_bytes, max_row_tile, use_bf16_exp)."""
    try:
        kind = jax.devices()[0].device_kind.lower()
    except Exception:  # pragma: no cover - defensive only
        kind = ""
    is_pre_v6 = any(t in kind for t in ("v2", "v3", "v4", "v5"))
    is_v6 = "v6" in kind
    if is_pre_v6 or is_v6:
        vmem_limit = 100 * 1024 * 1024   # 128 MiB physical VMEM on v5e/v6e
        max_row_tile = 512
    else:
        vmem_limit = 48 * 1024 * 1024    # conservative for v7x (64 MiB physical)
        max_row_tile = 256
    use_bf16_exp = not is_pre_v6 and kind != ""   # v6e/v7x EUP supports bf16
    return vmem_limit, max_row_tile, use_bf16_exp


def _layernorm_f32(v, gamma, beta):
    mu = jnp.mean(v, axis=-1, keepdims=True)
    var = jnp.mean((v - mu) ** 2, axis=-1, keepdims=True)
    return (v - mu) * jax.lax.rsqrt(var + _LN_EPS) * gamma + beta


def _attn_kernel(n_head, causal, tq, use_bf16_exp,
                 x_ref, wq_ref, bq_ref, wk_ref, wv_ref, bv_ref,
                 wo_ref, bo_ref, g1_ref, be1_ref,
                 o_ref,
                 k_scr, v_scr, wv_scr):
    """x1 = x + out_proj(softmax(q k^T * D**-0.5 + mask) v), one (batch, q-tile)."""
    qt = pl.program_id(1)
    T = x_ref.shape[1]
    C = x_ref.shape[2]
    D = C // n_head
    sm_scale = float(D) ** -0.5      # == D**-0.25 applied to both q and k

    # K/V for the whole sequence once per batch element; kept in bf16 VMEM
    # scratch across all query tiles of this batch element.
    @pl.when(qt == 0)
    def _():
        xf = x_ref[0].astype(jnp.float32)                                 # (T, C)
        hf = _layernorm_f32(xf, g1_ref[0], be1_ref[0]).astype(jnp.bfloat16)
        k_scr[...] = jnp.dot(hf, wk_ref[...],                             # key: no bias
                             preferred_element_type=jnp.float32).astype(jnp.bfloat16)
        v_scr[...] = (jnp.dot(hf, wv_ref[...], preferred_element_type=jnp.float32)
                      + bv_ref[0]).astype(jnp.bfloat16)

    row0 = qt * tq
    if tq % 8 == 0:
        row0 = pl.multiple_of(row0, 8)
    x_tile = x_ref[0, pl.ds(row0, tq), :].astype(jnp.float32)             # (tq, C)
    h16 = _layernorm_f32(x_tile, g1_ref[0], be1_ref[0]).astype(jnp.bfloat16)
    # bf16 cast fused onto the dot output so the f32 q dies immediately.
    q16 = ((jnp.dot(h16, wq_ref[...], preferred_element_type=jnp.float32)
            + bq_ref[0]) * sm_scale).astype(jnp.bfloat16)                  # (tq, C)

    if causal:
        rowi = row0 + lax.broadcasted_iota(jnp.int32, (tq, 1), 0)
        coli = lax.broadcasted_iota(jnp.int32, (1, T), 1)
        future = coli > rowi                                               # (tq, T) bool

    # Per-head attention core; each head's output lands in its column slice of
    # the (tq, C) bf16 scratch so the output projection is ONE full-K matmul.
    for hh in range(n_head):
        qh = q16[:, hh * D:(hh + 1) * D]                                   # (tq, D)
        kh = k_scr[:, pl.ds(hh * D, D)]                                    # (T, D)
        vh = v_scr[:, pl.ds(hh * D, D)]                                    # (T, D)
        logits = lax.dot_general(qh, kh, (((1,), (1,)), ((), ())),
                                 preferred_element_type=jnp.float32)       # (tq, T)
        if causal:
            logits = jnp.where(future, jnp.float32(-1e9), logits)
        m = jnp.max(logits, axis=-1, keepdims=True)
        shifted = logits - m
        if use_bf16_exp:
            e = jnp.exp(shifted.astype(jnp.bfloat16)).astype(jnp.float32)  # EUP bf16 exp
        else:
            e = jnp.exp(shifted)
        denom = jnp.sum(e, axis=-1, keepdims=True)
        p16 = (e * pl.reciprocal(denom, approx=True)).astype(jnp.bfloat16)
        oh = jnp.dot(p16, vh, preferred_element_type=jnp.float32)          # (tq, D)
        wv_scr[:, pl.ds(hh * D, D)] = oh.astype(jnp.bfloat16)

    attn = jnp.dot(wv_scr[...], wo_ref[...],
                   preferred_element_type=jnp.float32) + bo_ref[0]
    o_ref[0] = (x_tile + attn).astype(o_ref.dtype)


def _mlp_kernel(x_ref, w1_ref, b1_ref, w2_ref, b2_ref, g2_ref, be2_ref, o_ref):
    """y = x + fc2(gelu(fc1(mlp_ln(x)))) on a (row_tile, C) slab."""
    x = x_ref[...].astype(jnp.float32)
    h16 = _layernorm_f32(x, g2_ref[0], be2_ref[0]).astype(jnp.bfloat16)
    # nn.GELU() default = exact erf; bf16 cast fused onto the GELU output.
    m16 = jax.nn.gelu(jnp.dot(h16, w1_ref[...], preferred_element_type=jnp.float32)
                      + b1_ref[0], approximate=False).astype(jnp.bfloat16)
    y = jnp.dot(m16, w2_ref[...], preferred_element_type=jnp.float32) + b2_ref[0]
    o_ref[...] = (x + y).astype(o_ref.dtype)


def _pick_divisor_tile(n, max_tile):
    """Largest divisor of n that is a multiple of 8 and <= max_tile; else n (full)."""
    for t in range(min(n, max_tile), 7, -1):
        if n % t == 0 and t % 8 == 0:
            return t
    return n


def _pick_row_tile(rows, max_tile):
    """Row tile for the MLP; ragged last tile is handled with a cdiv grid."""
    if rows <= max_tile:
        return rows                      # block == full dim is always legal
    return max(8, (max_tile // 8) * 8)   # multiple of 8; last tile may be partial


def residual_attention_block(x, params, n_head, causal=True,
                             max_q_tile=256, max_row_tile=None,
                             vmem_limit_bytes=None, use_bf16_exp=None):
    B, T, C = x.shape
    n_mlp = params["w1"].shape[1]
    assert C % n_head == 0

    dflt_vmem, dflt_row_tile, dflt_bf16_exp = _device_defaults()
    if vmem_limit_bytes is None:
        vmem_limit_bytes = dflt_vmem
    if max_row_tile is None:
        max_row_tile = dflt_row_tile
    if use_bf16_exp is None:
        use_bf16_exp = dflt_bf16_exp

    bf16 = lambda a: a.astype(jnp.bfloat16)
    f32 = lambda a: a.astype(jnp.float32)
    # Weights in bf16 (MXU-native, halves VMEM/HBM); biases + LN affine stay f32.
    wq, wk = bf16(params["wq"]), bf16(params["wk"])
    wv, wo = bf16(params["wv"]), bf16(params["wo"])
    w1, w2 = bf16(params["w1"]), bf16(params["w2"])
    bq, bv, bo = f32(params["bq"]), f32(params["bv"]), f32(params["bo"])
    b1, b2 = f32(params["b1"]), f32(params["b2"])
    g1, be1 = f32(params["g1"]), f32(params["be1"])
    g2, be2 = f32(params["g2"]), f32(params["be2"])

    # ---- attention branch: x1 = x + attn(attn_ln(x)); grid (batch, q tiles) ----
    tq = _pick_divisor_tile(T, max_q_tile)
    n_qt = T // tq
    full2d_a = lambda shape: pl.BlockSpec(shape, lambda b, q: (0, 0))
    attn_cost = pl.CostEstimate(
        flops=B * (8 * T * C * C + 4 * T * T * C),
        transcendentals=B * n_head * T * T,
        bytes_accessed=2 * B * T * C * 4 + 4 * C * C * 2 + 8 * C * 4,
    )
    x1 = pl.pallas_call(
        functools.partial(_attn_kernel, n_head, causal, tq, use_bf16_exp),
        out_shape=jax.ShapeDtypeStruct((B, T, C), x.dtype),
        grid=(B, n_qt),
        in_specs=[
            pl.BlockSpec((1, T, C), lambda b, q: (b, 0, 0)),   # x (full seq per batch)
            full2d_a((C, C)), full2d_a((1, C)),                # wq, bq
            full2d_a((C, C)),                                  # wk (no bias)
            full2d_a((C, C)), full2d_a((1, C)),                # wv, bv
            full2d_a((C, C)), full2d_a((1, C)),                # wo, bo
            full2d_a((1, C)), full2d_a((1, C)),                # attn_ln gamma, beta
        ],
        out_specs=pl.BlockSpec((1, tq, C), lambda b, q: (b, q, 0)),
        scratch_shapes=[
            pltpu.VMEM((T, C), jnp.bfloat16),    # K16 (whole sequence)
            pltpu.VMEM((T, C), jnp.bfloat16),    # V16 (whole sequence)
            pltpu.VMEM((tq, C), jnp.bfloat16),   # per-head outputs -> one out-proj dot
        ],
        compiler_params=pltpu.CompilerParams(
            dimension_semantics=("parallel", "arbitrary"),
            vmem_limit_bytes=vmem_limit_bytes),
        cost_estimate=attn_cost,
    )(x, wq, bq, wk, wv, bv, wo, bo, g1, be1)

    # ---- MLP branch: out = x1 + mlp(mlp_ln(x1)); grid over row tiles ----
    rows = B * T
    tr = _pick_row_tile(rows, max_row_tile)
    n_rt = pl.cdiv(rows, tr)                      # padded last tile if ragged
    full2d_m = lambda shape: pl.BlockSpec(shape, lambda r: (0, 0))
    mlp_cost = pl.CostEstimate(
        flops=4 * rows * C * n_mlp,
        transcendentals=rows * n_mlp,
        bytes_accessed=2 * rows * C * 4 + 2 * C * n_mlp * 2,
    )
    out2d = pl.pallas_call(
        _mlp_kernel,
        out_shape=jax.ShapeDtypeStruct((rows, C), x.dtype),
        grid=(n_rt,),
        in_specs=[
            pl.BlockSpec((tr, C), lambda r: (r, 0)),           # x1 row tile
            full2d_m((C, n_mlp)), full2d_m((1, n_mlp)),        # mlp fc1
            full2d_m((n_mlp, C)), full2d_m((1, C)),            # mlp fc2
            full2d_m((1, C)), full2d_m((1, C)),                # mlp_ln gamma, beta
        ],
        out_specs=pl.BlockSpec((tr, C), lambda r: (r, 0)),
        compiler_params=pltpu.CompilerParams(
            dimension_semantics=("parallel",),
            vmem_limit_bytes=vmem_limit_bytes),
        cost_estimate=mlp_cost,
    )(x1.reshape(rows, C), w1, b1, w2, b2, g2, be2)
    return out2d.reshape(B, T, C)


# -------------- pure-JAX f32 reference (mirrors the PyTorch semantics) --------------
def reference_block(x, mask, p, n_head):
    def ln(v, g, b):
        mu = v.mean(-1, keepdims=True)
        var = ((v - mu) ** 2).mean(-1, keepdims=True)
        return (v - mu) / jnp.sqrt(var + _LN_EPS) * g + b

    B, T, C = x.shape
    D = C // n_head
    scale = float(D) ** -0.25

    h = ln(x, p["g1"][0], p["be1"][0])
    q = h @ p["wq"] + p["bq"][0]
    k = h @ p["wk"]
    v = h @ p["wv"] + p["bv"][0]

    q = (q.reshape(B, T, n_head, D) * scale).transpose(0, 2, 1, 3)
    kT = (k.reshape(B, T, n_head, D) * scale).transpose(0, 2, 3, 1)
    vv = v.reshape(B, T, n_head, D).transpose(0, 2, 1, 3)
    w = jax.nn.softmax(q @ kT + mask[None, None], axis=-1)
    wv = (w @ vv).transpose(0, 2, 1, 3).reshape(B, T, C)
    x = x + (wv @ p["wo"] + p["bo"][0])

    h2 = ln(x, p["g2"][0], p["be2"][0])
    m = jax.nn.gelu(h2 @ p["w1"] + p["b1"][0], approximate=False)
    return x + (m @ p["w2"] + p["b2"][0])


if __name__ == "__main__":
    # Small but lane-dense config: C = 128 so matmul operands are full-lane.
    B, T, C, H = 2, 16, 128, 4
    n_mlp = 4 * C

    key = jax.random.PRNGKey(0)
    keys = jax.random.split(key, 12)
    w = lambda k, shape: jax.random.normal(k, shape, dtype=jnp.float32) * 0.05

    # Weights stored as (in, out); bq/bv/bo/b1/b2 as (1, out). (Only the layout
    # differs from torch's (out, in) Linear weight; semantics are identical.)
    params = {
        "wq": w(keys[0], (C, C)), "bq": w(keys[1], (1, C)),
        "wk": w(keys[2], (C, C)),
        "wv": w(keys[3], (C, C)), "bv": w(keys[4], (1, C)),
        "wo": w(keys[5], (C, C)), "bo": w(keys[6], (1, C)),
        "g1": jnp.ones((1, C), jnp.float32), "be1": jnp.zeros((1, C), jnp.float32),
        "w1": w(keys[7], (C, n_mlp)), "b1": w(keys[8], (1, n_mlp)),
        "w2": w(keys[9], (n_mlp, C)), "b2": w(keys[10], (1, C)),
        "g2": jnp.ones((1, C), jnp.float32), "be2": jnp.zeros((1, C), jnp.float32),
    }

    x = jax.random.normal(keys[11], (B, T, C), dtype=jnp.float32)

    # max_q_tile=8 -> 2 query tiles per batch element (exercises the K/V scratch
    # persistence across q tiles); max_row_tile=16 -> 2 MLP row-tile steps.
    out = residual_attention_block(x, params, H, causal=True,
                                   max_q_tile=8, max_row_tile=16)
    out = jax.block_until_ready(out)

    # Reference uses the same additive causal mask the kernel builds in-kernel.
    mask = jnp.triu(jnp.full((T, T), -1e9, jnp.float32), k=1)
    ref = reference_block(x, mask, params, H)
    # bf16 matmul inputs + bf16 exp + approx reciprocal -> loosened tolerance.
    np.testing.assert_allclose(np.asarray(out), np.asarray(ref), rtol=4e-2, atol=4e-2)

    print("KERNEL_OK")
</pallas_src>

<mosaic_0001>
module attributes {stable_mosaic.version = 11 : i64} {
  func.func @_attn_kernel(%arg0: i32, %arg1: i32, %arg2: memref<1x16x128xf32, #tpu.memory_space<vmem>>, %arg3: memref<128x128xbf16, #tpu.memory_space<vmem>>, %arg4: memref<1x128xf32, #tpu.memory_space<vmem>>, %arg5: memref<128x128xbf16, #tpu.memory_space<vmem>>, %arg6: memref<128x128xbf16, #tpu.memory_space<vmem>>, %arg7: memref<1x128xf32, #tpu.memory_space<vmem>>, %arg8: memref<128x128xbf16, #tpu.memory_space<vmem>>, %arg9: memref<1x128xf32, #tpu.memory_space<vmem>>, %arg10: memref<1x128xf32, #tpu.memory_space<vmem>>, %arg11: memref<1x128xf32, #tpu.memory_space<vmem>>, %arg12: memref<1x8x128xf32, #tpu.memory_space<vmem>>, %arg13: memref<16x128xbf16, #tpu.memory_space<vmem>>, %arg14: memref<16x128xbf16, #tpu.memory_space<vmem>>, %arg15: memref<8x128xbf16, #tpu.memory_space<vmem>>) attributes {dimension_semantics = [#tpu.dimension_semantics<parallel>, #tpu.dimension_semantics<arbitrary>], iteration_bounds = array<i64: 2, 2>, scalar_prefetch = 0 : i64, scratch_operands = 3 : i64, tpu.core_type = #tpu.core_type<tc>, window_params = [{transform_indices = @transform_0, window_bounds = array<i64: 1, 16, 128>}, {pipeline_mode = #tpu.pipeline_mode<synchronous>, transform_indices = @transform_1, window_bounds = array<i64: 128, 128>}, {pipeline_mode = #tpu.pipeline_mode<synchronous>, transform_indices = @transform_2, window_bounds = array<i64: 1, 128>}, {pipeline_mode = #tpu.pipeline_mode<synchronous>, transform_indices = @transform_3, window_bounds = array<i64: 128, 128>}, {pipeline_mode = #tpu.pipeline_mode<synchronous>, transform_indices = @transform_4, window_bounds = array<i64: 128, 128>}, {pipeline_mode = #tpu.pipeline_mode<synchronous>, transform_indices = @transform_5, window_bounds = array<i64: 1, 128>}, {pipeline_mode = #tpu.pipeline_mode<synchronous>, transform_indices = @transform_6, window_bounds = array<i64: 128, 128>}, {pipeline_mode = #tpu.pipeline_mode<synchronous>, transform_indices = @transform_7, window_bounds = array<i64: 1, 128>}, {pipeline_mode = #tpu.pipeline_mode<synchronous>, transform_indices = @transform_8, window_bounds = array<i64: 1, 128>}, {pipeline_mode = #tpu.pipeline_mode<synchronous>, transform_indices = @transform_9, window_bounds = array<i64: 1, 128>}, {transform_indices = @transform_10, window_bounds = array<i64: 1, 8, 128>}]} {
    %c0_i32 = arith.constant 0 : i32
    %0 = arith.cmpi eq, %arg1, %c0_i32 : i32
    %1 = arith.extui %0 : i1 to i32
    %c0_i32_0 = arith.constant 0 : i32
    %2 = arith.cmpi ne, %1, %c0_i32_0 : i32
    scf.if %2 {
      %c0_67 = arith.constant 0 : index
      %c0_68 = arith.constant 0 : index
      %c0_69 = arith.constant 0 : index
      %154 = vector.load %arg2[%c0_67, %c0_68, %c0_69] : memref<1x16x128xf32, #tpu.memory_space<vmem>>, vector<1x16x128xf32>
      %155 = vector.shape_cast %154 : vector<1x16x128xf32> to vector<16x128xf32>
      %c0_70 = arith.constant 0 : index
      %c0_71 = arith.constant 0 : index
      %156 = vector.load %arg10[%c0_70, %c0_71] : memref<1x128xf32, #tpu.memory_space<vmem>>, vector<1x128xf32>
      %157 = vector.shape_cast %156 : vector<1x128xf32> to vector<128xf32>
      %c0_72 = arith.constant 0 : index
      %c0_73 = arith.constant 0 : index
      %158 = vector.load %arg11[%c0_72, %c0_73] : memref<1x128xf32, #tpu.memory_space<vmem>>, vector<1x128xf32>
      %159 = vector.shape_cast %158 : vector<1x128xf32> to vector<128xf32>
      %cst_74 = arith.constant dense<0.000000e+00> : vector<16xf32>
      %160 = vector.multi_reduction <add>, %155, %cst_74 [1] : vector<16x128xf32> to vector<16xf32>
      %161 = vector.shape_cast %160 : vector<16xf32> to vector<16x1xf32>
      %cst_75 = arith.constant 1.280000e+02 : f32
      %162 = vector.broadcast %cst_75 : f32 to vector<16x1xf32>
      %163 = arith.divf %161, %162 : vector<16x1xf32>
      %164 = vector.broadcast %163 : vector<16x1xf32> to vector<16x128xf32>
      %165 = arith.subf %155, %164 : vector<16x128xf32>
      %166 = arith.mulf %165, %165 : vector<16x128xf32>
      %cst_76 = arith.constant dense<0.000000e+00> : vector<16xf32>
      %167 = vector.multi_reduction <add>, %166, %cst_76 [1] : vector<16x128xf32> to vector<16xf32>
      %168 = vector.shape_cast %167 : vector<16xf32> to vector<16x1xf32>
      %cst_77 = arith.constant 1.280000e+02 : f32
      %169 = vector.broadcast %cst_77 : f32 to vector<16x1xf32>
      %170 = arith.divf %168, %169 : vector<16x1xf32>
      %171 = vector.broadcast %163 : vector<16x1xf32> to vector<16x128xf32>
      %172 = arith.subf %155, %171 : vector<16x128xf32>
      %cst_78 = arith.constant 9.99999974E-6 : f32
      %173 = vector.broadcast %cst_78 : f32 to vector<16x1xf32>
      %174 = arith.addf %170, %173 : vector<16x1xf32>
      %175 = math.rsqrt %174 : vector<16x1xf32>
      %176 = vector.broadcast %175 : vector<16x1xf32> to vector<16x128xf32>
      %177 = arith.mulf %172, %176 : vector<16x128xf32>
      %178 = vector.shape_cast %157 : vector<128xf32> to vector<1x128xf32>
      %179 = vector.broadcast %178 : vector<1x128xf32> to vector<16x128xf32>
      %180 = arith.mulf %177, %179 : vector<16x128xf32>
      %181 = vector.shape_cast %159 : vector<128xf32> to vector<1x128xf32>
      %182 = vector.broadcast %181 : vector<1x128xf32> to vector<16x128xf32>
      %183 = arith.addf %180, %182 : vector<16x128xf32>
      %184 = arith.truncf %183 : vector<16x128xf32> to vector<16x128xbf16>
      %c0_79 = arith.constant 0 : index
      %c0_80 = arith.constant 0 : index
      %185 = vector.load %arg5[%c0_79, %c0_80] : memref<128x128xbf16, #tpu.memory_space<vmem>>, vector<128x128xbf16>
      %cst_81 = arith.constant dense<0.000000e+00> : vector<16x128xf32>
      %186 = tpu.matmul %184, %185, %cst_81 {dimension_numbers = #tpu.dot_dimension_numbers<[1], [0], [0], [1], [0, 0, 1, 1], [], []>} : vector<16x128xbf16>, vector<128x128xbf16>, vector<16x128xf32> -> vector<16x128xf32>
      %187 = arith.truncf %186 : vector<16x128xf32> to vector<16x128xbf16>
      %c0_82 = arith.constant 0 : index
      %c0_83 = arith.constant 0 : index
      %188 = vector.load %arg13[%c0_82, %c0_83] : memref<16x128xbf16, #tpu.memory_space<vmem>>, vector<16x128xbf16>
      tpu.vector_store %arg13[%c0_82, %c0_83], %187 {strides = array<i32>} : memref<16x128xbf16, #tpu.memory_space<vmem>>, vector<16x128xbf16>,
      %c0_84 = arith.constant 0 : index
      %c0_85 = arith.constant 0 : index
      %189 = vector.load %arg6[%c0_84, %c0_85] : memref<128x128xbf16, #tpu.memory_space<vmem>>, vector<128x128xbf16>
      %cst_86 = arith.constant dense<0.000000e+00> : vector<16x128xf32>
      %190 = tpu.matmul %184, %189, %cst_86 {dimension_numbers = #tpu.dot_dimension_numbers<[1], [0], [0], [1], [0, 0, 1, 1], [], []>} : vector<16x128xbf16>, vector<128x128xbf16>, vector<16x128xf32> -> vector<16x128xf32>
      %c0_87 = arith.constant 0 : index
      %c0_88 = arith.constant 0 : index
      %191 = vector.load %arg7[%c0_87, %c0_88] : memref<1x128xf32, #tpu.memory_space<vmem>>, vector<1x128xf32>
      %192 = vector.shape_cast %191 : vector<1x128xf32> to vector<128xf32>
      %193 = vector.shape_cast %192 : vector<128xf32> to vector<1x128xf32>
      %194 = vector.broadcast %193 : vector<1x128xf32> to vector<16x128xf32>
      %195 = arith.addf %190, %194 : vector<16x128xf32>
      %196 = arith.truncf %195 : vector<16x128xf32> to vector<16x128xbf16>
      %c0_89 = arith.constant 0 : index
      %c0_90 = arith.constant 0 : index
      %197 = vector.load %arg14[%c0_89, %c0_90] : memref<16x128xbf16, #tpu.memory_space<vmem>>, vector<16x128xbf16>
      tpu.vector_store %arg14[%c0_89, %c0_90], %196 {strides = array<i32>} : memref<16x128xbf16, #tpu.memory_space<vmem>>, vector<16x128xbf16>,
    } else {
    }
    %c8_i32 = arith.constant 8 : i32
    %3 = arith.muli %arg1, %c8_i32 : i32
    %4 = tpu.assume_multiple %3, 8 : i32
    %c0 = arith.constant 0 : index
    %5 = arith.index_cast %4 : i32 to index
    %c0_1 = arith.constant 0 : index
    %6 = vector.load %arg2[%c0, %5, %c0_1] : memref<1x16x128xf32, #tpu.memory_space<vmem>>, vector<1x8x128xf32>
    %7 = vector.shape_cast %6 : vector<1x8x128xf32> to vector<8x128xf32>
    %c0_2 = arith.constant 0 : index
    %c0_3 = arith.constant 0 : index
    %8 = vector.load %arg10[%c0_2, %c0_3] : memref<1x128xf32, #tpu.memory_space<vmem>>, vector<1x128xf32>
    %9 = vector.shape_cast %8 : vector<1x128xf32> to vector<128xf32>
    %c0_4 = arith.constant 0 : index
    %c0_5 = arith.constant 0 : index
    %10 = vector.load %arg11[%c0_4, %c0_5] : memref<1x128xf32, #tpu.memory_space<vmem>>, vector<1x128xf32>
    %11 = vector.shape_cast %10 : vector<1x128xf32> to vector<128xf32>
    %cst = arith.constant dense<0.000000e+00> : vector<8xf32>
    %12 = vector.multi_reduction <add>, %7, %cst [1] : vector<8x128xf32> to vector<8xf32>
    %13 = vector.shape_cast %12 : vector<8xf32> to vector<8x1xf32>
    %cst_6 = arith.constant 1.280000e+02 : f32
    %14 = vector.broadcast %cst_6 : f32 to vector<8x1xf32>
    %15 = arith.divf %13, %14 : vector<8x1xf32>
    %16 = vector.broadcast %15 : vector<8x1xf32> to vector<8x128xf32>
    %17 = arith.subf %7, %16 : vector<8x128xf32>
    %18 = arith.mulf %17, %17 : vector<8x128xf32>
    %cst_7 = arith.constant dense<0.000000e+00> : vector<8xf32>
    %19 = vector.multi_reduction <add>, %18, %cst_7 [1] : vector<8x128xf32> to vector<8xf32>
    %20 = vector.shape_cast %19 : vector<8xf32> to vector<8x1xf32>
    %cst_8 = arith.constant 1.280000e+02 : f32
    %21 = vector.broadcast %cst_8 : f32 to vector<8x1xf32>
    %22 = arith.divf %20, %21 : vector<8x1xf32>
    %23 = vector.broadcast %15 : vector<8x1xf32> to vector<8x128xf32>
    %24 = arith.subf %7, %23 : vector<8x128xf32>
    %cst_9 = arith.constant 9.99999974E-6 : f32
    %25 = vector.broadcast %cst_9 : f32 to vector<8x1xf32>
    %26 = arith.addf %22, %25 : vector<8x1xf32>
    %27 = math.rsqrt %26 : vector<8x1xf32>
    %28 = vector.broadcast %27 : vector<8x1xf32> to vector<8x128xf32>
    %29 = arith.mulf %24, %28 : vector<8x128xf32>
    %30 = vector.shape_cast %9 : vector<128xf32> to vector<1x128xf32>
    %31 = vector.broadcast %30 : vector<1x128xf32> to vector<8x128xf32>
    %32 = arith.mulf %29, %31 : vector<8x128xf32>
    %33 = vector.shape_cast %11 : vector<128xf32> to vector<1x128xf32>
    %34 = vector.broadcast %33 : vector<1x128xf32> to vector<8x128xf32>
    %35 = arith.addf %32, %34 : vector<8x128xf32>
    %36 = arith.truncf %35 : vector<8x128xf32> to vector<8x128xbf16>
    %c0_10 = arith.constant 0 : index
    %c0_11 = arith.constant 0 : index
    %37 = vector.load %arg3[%c0_10, %c0_11] : memref<128x128xbf16, #tpu.memory_space<vmem>>, vector<128x128xbf16>
    %cst_12 = arith.constant dense<0.000000e+00> : vector<8x128xf32>
    %38 = tpu.matmul %36, %37, %cst_12 {dimension_numbers = #tpu.dot_dimension_numbers<[1], [0], [0], [1], [0, 0, 1, 1], [], []>} : vector<8x128xbf16>, vector<128x128xbf16>, vector<8x128xf32> -> vector<8x128xf32>
    %c0_13 = arith.constant 0 : index
    %c0_14 = arith.constant 0 : index
    %39 = vector.load %arg4[%c0_13, %c0_14] : memref<1x128xf32, #tpu.memory_space<vmem>>, vector<1x128xf32>
    %40 = vector.shape_cast %39 : vector<1x128xf32> to vector<128xf32>
    %41 = vector.shape_cast %40 : vector<128xf32> to vector<1x128xf32>
    %42 = vector.broadcast %41 : vector<1x128xf32> to vector<8x128xf32>
    %43 = arith.addf %38, %42 : vector<8x128xf32>
    %cst_15 = arith.constant 0.176776692 : f32
    %44 = vector.broadcast %cst_15 : f32 to vector<8x128xf32>
    %45 = arith.mulf %43, %44 : vector<8x128xf32>
    %46 = arith.truncf %45 : vector<8x128xf32> to vector<8x128xbf16>
    %47 = tpu.iota {dimensions = array<i32: 0>} : vector<8x1xi32>
    %48 = vector.broadcast %4 : i32 to vector<8x1xi32>
    %49 = arith.addi %48, %47 : vector<8x1xi32>
    %50 = tpu.iota {dimensions = array<i32: 1>} : vector<1x16xi32>
    %51 = vector.broadcast %50 : vector<1x16xi32> to vector<8x16xi32>
    %52 = vector.broadcast %49 : vector<8x1xi32> to vector<8x16xi32>
    %53 = arith.cmpi sgt, %51, %52 : vector<8x16xi32>
    %54 = vector.extract_strided_slice %46 {offsets = [0, 0], sizes = [8, 32], strides = [1, 1]} : vector<8x128xbf16> to vector<8x32xbf16>
    %c0_16 = arith.constant 0 : index
    %c0_17 = arith.constant 0 : index
    %55 = vector.load %arg13[%c0_16, %c0_17] : memref<16x128xbf16, #tpu.memory_space<vmem>>, vector<16x32xbf16>
    %c0_18 = arith.constant 0 : index
    %c0_19 = arith.constant 0 : index
    %56 = vector.load %arg14[%c0_18, %c0_19] : memref<16x128xbf16, #tpu.memory_space<vmem>>, vector<16x32xbf16>
    %cst_20 = arith.constant dense<0.000000e+00> : vector<8x16xf32>
    %57 = tpu.matmul %54, %55, %cst_20 {dimension_numbers = #tpu.dot_dimension_numbers<[1], [1], [0], [0], [0, 0, 1, 0], [], []>} : vector<8x32xbf16>, vector<16x32xbf16>, vector<8x16xf32> -> vector<8x16xf32>
    %cst_21 = arith.constant -1.000000e+09 : f32
    %58 = vector.broadcast %cst_21 : f32 to vector<8x16xf32>
    %59 = arith.select %53, %58, %57 : vector<8x16xi1>, vector<8x16xf32>
    %cst_22 = arith.constant dense<0xFF800000> : vector<8xf32>
    %60 = vector.multi_reduction <maximumf>, %59, %cst_22 [1] : vector<8x16xf32> to vector<8xf32>
    %61 = vector.shape_cast %60 : vector<8xf32> to vector<8x1xf32>
    %62 = vector.broadcast %61 : vector<8x1xf32> to vector<8x16xf32>
    %63 = arith.subf %59, %62 : vector<8x16xf32>
    %64 = arith.truncf %63 : vector<8x16xf32> to vector<8x16xbf16>
    %65 = math.exp %64 : vector<8x16xbf16>
    %66 = arith.extf %65 : vector<8x16xbf16> to vector<8x16xf32>
    %cst_23 = arith.constant dense<0.000000e+00> : vector<8xf32>
    %67 = vector.multi_reduction <add>, %66, %cst_23 [1] : vector<8x16xf32> to vector<8xf32>
    %68 = vector.shape_cast %67 : vector<8xf32> to vector<8x1xf32>
    %69 = tpu.reciprocal %68 {approx = true} : vector<8x1xf32> -> vector<8x1xf32>
    %70 = vector.broadcast %69 : vector<8x1xf32> to vector<8x16xf32>
    %71 = arith.mulf %66, %70 : vector<8x16xf32>
    %72 = arith.truncf %71 : vector<8x16xf32> to vector<8x16xbf16>
    %cst_24 = arith.constant dense<0.000000e+00> : vector<8x32xf32>
    %73 = tpu.matmul %72, %56, %cst_24 {dimension_numbers = #tpu.dot_dimension_numbers<[1], [0], [0], [1], [0, 0, 1, 1], [], []>} : vector<8x16xbf16>, vector<16x32xbf16>, vector<8x32xf32> -> vector<8x32xf32>
    %74 = arith.truncf %73 : vector<8x32xf32> to vector<8x32xbf16>
    %c0_25 = arith.constant 0 : index
    %c0_26 = arith.constant 0 : index
    %75 = vector.load %arg15[%c0_25, %c0_26] : memref<8x128xbf16, #tpu.memory_space<vmem>>, vector<8x32xbf16>
    tpu.vector_store %arg15[%c0_25, %c0_26], %74 {strides = array<i32>} : memref<8x128xbf16, #tpu.memory_space<vmem>>, vector<8x32xbf16>,
    %76 = vector.extract_strided_slice %46 {offsets = [0, 32], sizes = [8, 32], strides = [1, 1]} : vector<8x128xbf16> to vector<8x32xbf16>
    %c0_27 = arith.constant 0 : index
    %c32 = arith.constant 32 : index
    %77 = vector.load %arg13[%c0_27, %c32] : memref<16x128xbf16, #tpu.memory_space<vmem>>, vector<16x32xbf16>
    %c0_28 = arith.constant 0 : index
    %c32_29 = arith.constant 32 : index
    %78 = vector.load %arg14[%c0_28, %c32_29] : memref<16x128xbf16, #tpu.memory_space<vmem>>, vector<16x32xbf16>
    %cst_30 = arith.constant dense<0.000000e+00> : vector<8x16xf32>
    %79 = tpu.matmul %76, %77, %cst_30 {dimension_numbers = #tpu.dot_dimension_numbers<[1], [1], [0], [0], [0, 0, 1, 0], [], []>} : vector<8x32xbf16>, vector<16x32xbf16>, vector<8x16xf32> -> vector<8x16xf32>
    %cst_31 = arith.constant -1.000000e+09 : f32
    %80 = vector.broadcast %cst_31 : f32 to vector<8x16xf32>
    %81 = arith.select %53, %80, %79 : vector<8x16xi1>, vector<8x16xf32>
    %cst_32 = arith.constant dense<0xFF800000> : vector<8xf32>
    %82 = vector.multi_reduction <maximumf>, %81, %cst_32 [1] : vector<8x16xf32> to vector<8xf32>
    %83 = vector.shape_cast %82 : vector<8xf32> to vector<8x1xf32>
    %84 = vector.broadcast %83 : vector<8x1xf32> to vector<8x16xf32>
    %85 = arith.subf %81, %84 : vector<8x16xf32>
    %86 = arith.truncf %85 : vector<8x16xf32> to vector<8x16xbf16>
    %87 = math.exp %86 : vector<8x16xbf16>
    %88 = arith.extf %87 : vector<8x16xbf16> to vector<8x16xf32>
    %cst_33 = arith.constant dense<0.000000e+00> : vector<8xf32>
    %89 = vector.multi_reduction <add>, %88, %cst_33 [1] : vector<8x16xf32> to vector<8xf32>
    %90 = vector.shape_cast %89 : vector<8xf32> to vector<8x1xf32>
    %91 = tpu.reciprocal %90 {approx = true} : vector<8x1xf32> -> vector<8x1xf32>
    %92 = vector.broadcast %91 : vector<8x1xf32> to vector<8x16xf32>
    %93 = arith.mulf %88, %92 : vector<8x16xf32>
    %94 = arith.truncf %93 : vector<8x16xf32> to vector<8x16xbf16>
    %cst_34 = arith.constant dense<0.000000e+00> : vector<8x32xf32>
    %95 = tpu.matmul %94, %78, %cst_34 {dimension_numbers = #tpu.dot_dimension_numbers<[1], [0], [0], [1], [0, 0, 1, 1], [], []>} : vector<8x16xbf16>, vector<16x32xbf16>, vector<8x32xf32> -> vector<8x32xf32>
    %96 = arith.truncf %95 : vector<8x32xf32> to vector<8x32xbf16>
    %c0_35 = arith.constant 0 : index
    %c32_36 = arith.constant 32 : index
    %97 = vector.load %arg15[%c0_35, %c32_36] : memref<8x128xbf16, #tpu.memory_space<vmem>>, vector<8x32xbf16>
    tpu.vector_store %arg15[%c0_35, %c32_36], %96 {strides = array<i32>} : memref<8x128xbf16, #tpu.memory_space<vmem>>, vector<8x32xbf16>,
    %98 = vector.extract_strided_slice %46 {offsets = [0, 64], sizes = [8, 32], strides = [1, 1]} : vector<8x128xbf16> to vector<8x32xbf16>
    %c0_37 = arith.constant 0 : index
    %c64 = arith.constant 64 : index
    %99 = vector.load %arg13[%c0_37, %c64] : memref<16x128xbf16, #tpu.memory_space<vmem>>, vector<16x32xbf16>
    %c0_38 = arith.constant 0 : index
    %c64_39 = arith.constant 64 : index
    %100 = vector.load %arg14[%c0_38, %c64_39] : memref<16x128xbf16, #tpu.memory_space<vmem>>, vector<16x32xbf16>
    %cst_40 = arith.constant dense<0.000000e+00> : vector<8x16xf32>
    %101 = tpu.matmul %98, %99, %cst_40 {dimension_numbers = #tpu.dot_dimension_numbers<[1], [1], [0], [0], [0, 0, 1, 0], [], []>} : vector<8x32xbf16>, vector<16x32xbf16>, vector<8x16xf32> -> vector<8x16xf32>
    %cst_41 = arith.constant -1.000000e+09 : f32
    %102 = vector.broadcast %cst_41 : f32 to vector<8x16xf32>
    %103 = arith.select %53, %102, %101 : vector<8x16xi1>, vector<8x16xf32>
    %cst_42 = arith.constant dense<0xFF800000> : vector<8xf32>
    %104 = vector.multi_reduction <maximumf>, %103, %cst_42 [1] : vector<8x16xf32> to vector<8xf32>
    %105 = vector.shape_cast %104 : vector<8xf32> to vector<8x1xf32>
    %106 = vector.broadcast %105 : vector<8x1xf32> to vector<8x16xf32>
    %107 = arith.subf %103, %106 : vector<8x16xf32>
    %108 = arith.truncf %107 : vector<8x16xf32> to vector<8x16xbf16>
    %109 = math.exp %108 : vector<8x16xbf16>
    %110 = arith.extf %109 : vector<8x16xbf16> to vector<8x16xf32>
    %cst_43 = arith.constant dense<0.000000e+00> : vector<8xf32>
    %111 = vector.multi_reduction <add>, %110, %cst_43 [1] : vector<8x16xf32> to vector<8xf32>
    %112 = vector.shape_cast %111 : vector<8xf32> to vector<8x1xf32>
    %113 = tpu.reciprocal %112 {approx = true} : vector<8x1xf32> -> vector<8x1xf32>
    %114 = vector.broadcast %113 : vector<8x1xf32> to vector<8x16xf32>
    %115 = arith.mulf %110, %114 : vector<8x16xf32>
    %116 = arith.truncf %115 : vector<8x16xf32> to vector<8x16xbf16>
    %cst_44 = arith.constant dense<0.000000e+00> : vector<8x32xf32>
    %117 = tpu.matmul %116, %100, %cst_44 {dimension_numbers = #tpu.dot_dimension_numbers<[1], [0], [0], [1], [0, 0, 1, 1], [], []>} : vector<8x16xbf16>, vector<16x32xbf16>, vector<8x32xf32> -> vector<8x32xf32>
    %118 = arith.truncf %117 : vector<8x32xf32> to vector<8x32xbf16>
    %c0_45 = arith.constant 0 : index
    %c64_46 = arith.constant 64 : index
    %119 = vector.load %arg15[%c0_45, %c64_46] : memref<8x128xbf16, #tpu.memory_space<vmem>>, vector<8x32xbf16>
    tpu.vector_store %arg15[%c0_45, %c64_46], %118 {strides = array<i32>} : memref<8x128xbf16, #tpu.memory_space<vmem>>, vector<8x32xbf16>,
    %120 = vector.extract_strided_slice %46 {offsets = [0, 96], sizes = [8, 32], strides = [1, 1]} : vector<8x128xbf16> to vector<8x32xbf16>
    %c0_47 = arith.constant 0 : index
    %c96 = arith.constant 96 : index
    %121 = vector.load %arg13[%c0_47, %c96] : memref<16x128xbf16, #tpu.memory_space<vmem>>, vector<16x32xbf16>
    %c0_48 = arith.constant 0 : index
    %c96_49 = arith.constant 96 : index
    %122 = vector.load %arg14[%c0_48, %c96_49] : memref<16x128xbf16, #tpu.memory_space<vmem>>, vector<16x32xbf16>
    %cst_50 = arith.constant dense<0.000000e+00> : vector<8x16xf32>
    %123 = tpu.matmul %120, %121, %cst_50 {dimension_numbers = #tpu.dot_dimension_numbers<[1], [1], [0], [0], [0, 0, 1, 0], [], []>} : vector<8x32xbf16>, vector<16x32xbf16>, vector<8x16xf32> -> vector<8x16xf32>
    %cst_51 = arith.constant -1.000000e+09 : f32
    %124 = vector.broadcast %cst_51 : f32 to vector<8x16xf32>
    %125 = arith.select %53, %124, %123 : vector<8x16xi1>, vector<8x16xf32>
    %cst_52 = arith.constant dense<0xFF800000> : vector<8xf32>
    %126 = vector.multi_reduction <maximumf>, %125, %cst_52 [1] : vector<8x16xf32> to vector<8xf32>
    %127 = vector.shape_cast %126 : vector<8xf32> to vector<8x1xf32>
    %128 = vector.broadcast %127 : vector<8x1xf32> to vector<8x16xf32>
    %129 = arith.subf %125, %128 : vector<8x16xf32>
    %130 = arith.truncf %129 : vector<8x16xf32> to vector<8x16xbf16>
    %131 = math.exp %130 : vector<8x16xbf16>
    %132 = arith.extf %131 : vector<8x16xbf16> to vector<8x16xf32>
    %cst_53 = arith.constant dense<0.000000e+00> : vector<8xf32>
    %133 = vector.multi_reduction <add>, %132, %cst_53 [1] : vector<8x16xf32> to vector<8xf32>
    %134 = vector.shape_cast %133 : vector<8xf32> to vector<8x1xf32>
    %135 = tpu.reciprocal %134 {approx = true} : vector<8x1xf32> -> vector<8x1xf32>
    %136 = vector.broadcast %135 : vector<8x1xf32> to vector<8x16xf32>
    %137 = arith.mulf %132, %136 : vector<8x16xf32>
    %138 = arith.truncf %137 : vector<8x16xf32> to vector<8x16xbf16>
    %cst_54 = arith.constant dense<0.000000e+00> : vector<8x32xf32>
    %139 = tpu.matmul %138, %122, %cst_54 {dimension_numbers = #tpu.dot_dimension_numbers<[1], [0], [0], [1], [0, 0, 1, 1], [], []>} : vector<8x16xbf16>, vector<16x32xbf16>, vector<8x32xf32> -> vector<8x32xf32>
    %140 = arith.truncf %139 : vector<8x32xf32> to vector<8x32xbf16>
    %c0_55 = arith.constant 0 : index
    %c96_56 = arith.constant 96 : index
    %141 = vector.load %arg15[%c0_55, %c96_56] : memref<8x128xbf16, #tpu.memory_space<vmem>>, vector<8x32xbf16>
    tpu.vector_store %arg15[%c0_55, %c96_56], %140 {strides = array<i32>} : memref<8x128xbf16, #tpu.memory_space<vmem>>, vector<8x32xbf16>,
    %c0_57 = arith.constant 0 : index
    %c0_58 = arith.constant 0 : index
    %142 = vector.load %arg15[%c0_57, %c0_58] : memref<8x128xbf16, #tpu.memory_space<vmem>>, vector<8x128xbf16>
    %c0_59 = arith.constant 0 : index
    %c0_60 = arith.constant 0 : index
    %143 = vector.load %arg8[%c0_59, %c0_60] : memref<128x128xbf16, #tpu.memory_space<vmem>>, vector<128x128xbf16>
    %cst_61 = arith.constant dense<0.000000e+00> : vector<8x128xf32>
    %144 = tpu.matmul %142, %143, %cst_61 {dimension_numbers = #tpu.dot_dimension_numbers<[1], [0], [0], [1], [0, 0, 1, 1], [], []>} : vector<8x128xbf16>, vector<128x128xbf16>, vector<8x128xf32> -> vector<8x128xf32>
    %c0_62 = arith.constant 0 : index
    %c0_63 = arith.constant 0 : index
    %145 = vector.load %arg9[%c0_62, %c0_63] : memref<1x128xf32, #tpu.memory_space<vmem>>, vector<1x128xf32>
    %146 = vector.shape_cast %145 : vector<1x128xf32> to vector<128xf32>
    %147 = vector.shape_cast %146 : vector<128xf32> to vector<1x128xf32>
    %148 = vector.broadcast %147 : vector<1x128xf32> to vector<8x128xf32>
    %149 = arith.addf %144, %148 : vector<8x128xf32>
    %150 = arith.addf %7, %149 : vector<8x128xf32>
    %c0_64 = arith.constant 0 : index
    %c0_65 = arith.constant 0 : index
    %c0_66 = arith.constant 0 : index
    %151 = vector.load %arg12[%c0_64, %c0_65, %c0_66] : memref<1x8x128xf32, #tpu.memory_space<vmem>>, vector<1x8x128xf32>
    %152 = vector.shape_cast %151 : vector<1x8x128xf32> to vector<8x128xf32>
    %153 = vector.shape_cast %150 : vector<8x128xf32> to vector<1x8x128xf32>
    tpu.vector_store %arg12[%c0_64, %c0_65, %c0_66], %153 {strides = array<i32>} : memref<1x8x128xf32, #tpu.memory_space<vmem>>, vector<1x8x128xf32>,
    return
  }
  func.func @transform_0(%arg0: i32, %arg1: i32) -> (i32, i32, i32) {
    %c0_i32 = arith.constant 0 : i32
    %c0_i32_0 = arith.constant 0 : i32
    %c0_i32_1 = arith.constant 0 : i32
    return %arg0, %c0_i32, %c0_i32_0 : i32, i32, i32
  }
  func.func @transform_1(%arg0: i32, %arg1: i32) -> (i32, i32) {
    %c0_i32 = arith.constant 0 : i32
    %c0_i32_0 = arith.constant 0 : i32
    %c0_i32_1 = arith.constant 0 : i32
    return %c0_i32, %c0_i32_0 : i32, i32
  }
  func.func @transform_2(%arg0: i32, %arg1: i32) -> (i32, i32) {
    %c0_i32 = arith.constant 0 : i32
    %c0_i32_0 = arith.constant 0 : i32
    %c0_i32_1 = arith.constant 0 : i32
    return %c0_i32, %c0_i32_0 : i32, i32
  }
  func.func @transform_3(%arg0: i32, %arg1: i32) -> (i32, i32) {
    %c0_i32 = arith.constant 0 : i32
    %c0_i32_0 = arith.constant 0 : i32
    %c0_i32_1 = arith.constant 0 : i32
    return %c0_i32, %c0_i32_0 : i32, i32
  }
  func.func @transform_4(%arg0: i32, %arg1: i32) -> (i32, i32) {
    %c0_i32 = arith.constant 0 : i32
    %c0_i32_0 = arith.constant 0 : i32
    %c0_i32_1 = arith.constant 0 : i32
    return %c0_i32, %c0_i32_0 : i32, i32
  }
  func.func @transform_5(%arg0: i32, %arg1: i32) -> (i32, i32) {
    %c0_i32 = arith.constant 0 : i32
    %c0_i32_0 = arith.constant 0 : i32
    %c0_i32_1 = arith.constant 0 : i32
    return %c0_i32, %c0_i32_0 : i32, i32
  }
  func.func @transform_6(%arg0: i32, %arg1: i32) -> (i32, i32) {
    %c0_i32 = arith.constant 0 : i32
    %c0_i32_0 = arith.constant 0 : i32
    %c0_i32_1 = arith.constant 0 : i32
    return %c0_i32, %c0_i32_0 : i32, i32
  }
  func.func @transform_7(%arg0: i32, %arg1: i32) -> (i32, i32) {
    %c0_i32 = arith.constant 0 : i32
    %c0_i32_0 = arith.constant 0 : i32
    %c0_i32_1 = arith.constant 0 : i32
    return %c0_i32, %c0_i32_0 : i32, i32
  }
  func.func @transform_8(%arg0: i32, %arg1: i32) -> (i32, i32) {
    %c0_i32 = arith.constant 0 : i32
    %c0_i32_0 = arith.constant 0 : i32
    %c0_i32_1 = arith.constant 0 : i32
    return %c0_i32, %c0_i32_0 : i32, i32
  }
  func.func @transform_9(%arg0: i32, %arg1: i32) -> (i32, i32) {
    %c0_i32 = arith.constant 0 : i32
    %c0_i32_0 = arith.constant 0 : i32
    %c0_i32_1 = arith.constant 0 : i32
    return %c0_i32, %c0_i32_0 : i32, i32
  }
  func.func @transform_10(%arg0: i32, %arg1: i32) -> (i32, i32, i32) {
    %c0_i32 = arith.constant 0 : i32
    %c0_i32_0 = arith.constant 0 : i32
    return %arg0, %arg1, %c0_i32 : i32, i32, i32
  }
}

</mosaic_0001>

<bundles_post_ra>
// kernel: tpu_custom_call.1
= control target key start
LH: loop header
LB: loop body
LE: loop exit
PB: predicated region body
PF: predicated region fallthrough
CT: control target
= control target key end

     0   :  { %s2469_s0 = inlined_call_operand.hbm [shape: f32[2,16,128], index: 0, kind: input, shape index: {}]   ;;  %s2470_s1 = inlined_call_operand.hbm [shape: bf16[128,128], index: 1, kind: input, shape index: {}]   ;;  %s2471_s2 = inlined_call_operand.vmem [shape: f32[1,128], index: 2, kind: input, shape index: {}]   ;;  %s2472_s3 = inlined_call_operand.hbm [shape: bf16[128,128], index: 3, kind: input, shape index: {}]   ;;  %s2473_s4 = inlined_call_operand.hbm [shape: bf16[128,128], index: 4, kind: input, shape index: {}]   ;;  %s2474_s5 = inlined_call_operand.vmem [shape: f32[1,128], index: 5, kind: input, shape index: {}]   ;;  %s2475_s6 = inlined_call_operand.hbm [shape: bf16[128,128], index: 6, kind: input, shape index: {}]   ;;  %s2476_s7 = inlined_call_operand.vmem [shape: f32[1,128], index: 7, kind: input, shape index: {}]   ;;  %s2477_s8 = inlined_call_operand.vmem [shape: f32[1,128], index: 8, kind: input, shape index: {}]   ;;  %s2478_s9 = inlined_call_operand.vmem [shape: f32[1,128], index: 9, kind: input, shape index: {}]   ;;  %s2479_s10 = inlined_call_operand.hbm [shape: f32[2,16,128], index: 10, kind: output, shape index: {}]  }
   0x1   :  { %2488 = sst [smem:[#allocation26_spill]] %s2470_s1 }
   0x2   :  { %2489 = sst [smem:[#allocation27_spill]] %s2471_s2 }
   0x3   :  { %2490 = sst [smem:[#allocation28_spill]] %s2472_s3 }
   0x4   :  { %2491 = sst [smem:[#allocation29_spill]] %s2473_s4 }
   0x5   :  { %2492 = sst [smem:[#allocation30_spill]] %s2474_s5 }
   0x6   :  { %2493 = sst [smem:[#allocation31_spill]] %s2475_s6 }
   0x7   :  { %2494 = sst [smem:[#allocation32_spill]] %s2476_s7 }
   0x8   :  { %2495 = sst [smem:[#allocation33_spill]] %s2479_s10 }
   0x9   :  { %15 = vsyncpa [#allocation6], 0 }
   0xa   :  { %17 = vsyncpa [#allocation6 + $0x1], 0 }
   0xb   :  { %18 = vsyncpa [#allocation9], 0 }
   0xc   :  { %19 = vsyncpa [#allocation12], 0 }
   0xd   :  { %20 = vsyncpa [#allocation7], 0 }
   0xe   :  { %22 = vsyncpa [#allocation7 + $0x1], 0  ;;  %s2145_s13 = smov 0   ;;  %s2147_s14 = smov 0  }
   0xf   :  { %s2149_s15 = smov 0   ;;  %s2151_s16 = smov 0  }
  0x10   :  { %s2153_s17 = smov 0   ;;  %s2155_s18 = smov 0  }
  0x11   :  { %s2157_s19 = smov 0   ;;  %s2159_s20 = smov 0  }
  0x12   :  { %s2161_s21 = smov 0   ;;  %s2163_s22 = smov 0  }
  0x13   :  { %s2165_s23 = smov 0  }
  0x14 LB: > { %2496 = sst [smem:[#allocation19_spill]] %s2035_s13  ;;  %s1366_s24 = sadd.s32 4294967295, %s2075_s23   ;;  %s2075_s23 = sphi %s2165_s23, %s28_s23   ;;  %s2071_s22 = sphi %s2163_s22, %s2532_s22   ;;  %s2067_s21 = sphi %s2161_s21, %s2523_s21   ;;  %s2063_s20 = sphi %s2159_s20, %s2531_s20   ;;  %s2059_s19 = sphi %s2157_s19, %s2522_s19   ;;  %s2055_s18 = sphi %s2155_s18, %s2530_s18   ;;  %s2051_s17 = sphi %s2153_s17, %s2529_s17   ;;  %s2047_s16 = sphi %s2151_s16, %s2528_s16   ;;  %s2043_s15 = sphi %s2149_s15, %s2527_s15   ;;  %s2039_s14 = sphi %s2147_s14, %s2526_s14   ;;  %s2035_s13 = sphi %s2145_s13, %s2525_s13  }
  0x15   : > { %2497 = sst [smem:[#allocation20_spill]] %s2063_s20  ;;  %s1367_s25 = sadd.s32 4294967294, %s2075_s23  }
  0x16   : > { %2498 = sst [smem:[#allocation21_spill]] %s2067_s21  ;;  %p60_p0 = scmp.ne.s32.totalorder %s2051_s17, %s2047_s16 }
  0x17   : > { %p2201_p1 = scmp.eq.s32.totalorder %s1366_s24, 0  ;;  %p274_p2 = scmp.ne.s32.totalorder %s2043_s15, %s2039_s14 }
  0x18   : > { %p275_p3 = scmp.eq.s32.totalorder %s1366_s24, 3  ;;  %p280_p5 = scmp.ne.s32.totalorder %s2039_s14, %s2035_s13 }
  0x19   : > { %p2209_p4 = por %p2201_p1, %p60_p0  ;;  %p281_p7 = scmp.eq.s32.totalorder %s1367_s25, 3 }
  0x1a   : > { %p2215_p6 = por %p275_p3, %p274_p2  ;;  %p1368_p8 = scmp.ge.s32.totalorder %s2075_s23, 1 }
  0x1b   : > { %p288_p9 = scmp.lt.s32.totalorder %s2075_s23, 5  ;;  %p2221_p10 = por %p281_p7, %p280_p5 }
  0x1c   : > { %s2501_s28 = scalar_select %p2215_p6, 1, 0 }
  0x1d   : > { %s2503_s29 = scalar_select %p2221_p10, 1, 0 }
  0x1e   : > { %2502 = sst [smem:[#allocation22_spill]] %s2501_s28  ;;  %p2225_p11 = pnand %p1368_p8, %p288_p9 }
  0x1f   : > { %2504 = sst [smem:[#allocation23_spill]] %s2503_s29  ;;  %s2077_s24 = smov [#allocation8]  }
  0x20   : > { %s2506_s1 = sld [smem:[#allocation26_spill]]  ;;  %p1630_p12 = pneg %p2225_p11 }
  0x21   : > { %s301_s25 = sshll.u32 %s2077_s24, 4  ;;  %s2508_s4 = sld [smem:[#allocation29_spill]]  ;;  %s302_s25 = int_to_ptr.vmem [resolvable:$true] %s301_s25 }
  0x22   : > { %p2236_p13 = pnand %p1630_p12, %p2201_p1  ;;  %s2078_s11 = smov 64  }
  0x23   : > { %s2079_s12 = smov 4   ;;  %s2509_s3 = sld [smem:[#allocation28_spill]] }
  0x24   : > { %s2080_s20 = smov [#allocation11]   ;;  %s2081_s10 = smov [#allocation10]  }
  0x25   : > { %s332_s2 = sshll.u32 %s2080_s20, 4  ;;  %s318_s29 = sshll.u32 %s2081_s10, 4  ;;  %s333_s2 = int_to_ptr.vmem [resolvable:$true] %s332_s2  ;;  %s319_s29 = int_to_ptr.vmem [resolvable:$true] %s318_s29 }
  0x26   : > { %s299_s16 = sshll.u32 %s2506_s1, 4  ;;  %s2510_s6 = sld [smem:[#allocation31_spill]]  ;;  %s300_s16 = int_to_ptr.hbm [resolvable:$true] %s299_s16 }
  0x27   : > { %s330_s28 = sshll.u32 %s2508_s4, 4  ;;  %s2082_s20 = smov [#allocation13]   ;;  %s331_s28 = int_to_ptr.hbm [resolvable:$true] %s330_s28 }
  0x28   : > { %1633 = dma.hbm_to_vmem [thread:$0]  (!%p2236_p13), %s300_s16, 1024, %s302_s25, [#allocation9], %s2078_s11, %s2078_s11, %s2079_s12  }
  0x29   : > { %s316_s7 = sshll.u32 %s2509_s3, 4  ;;  %s349_s24 = sshll.u32 %s2082_s20, 4  ;;  %s317_s7 = int_to_ptr.hbm [resolvable:$true] %s316_s7  ;;  %s350_s24 = int_to_ptr.vmem [resolvable:$true] %s349_s24 }
  0x2a   : > { %1639 = dma.hbm_to_vmem [thread:$0]  (!%p2236_p13), %s331_s28, 1024, %s333_s2, [#allocation12], %s2078_s11, %s2078_s11, %s2079_s12  }
  0x2b   : > { %1636 = dma.hbm_to_vmem [thread:$0]  (!%p2236_p13), %s317_s7, 1024, %s319_s29, [#allocation9], %s2078_s11, %s2078_s11, %s2079_s12  }
  0x2c   : > { %s347_s1 = sshll.u32 %s2510_s6, 4  ;;  %s37_s2 = sadd.s32 1, %s2067_s21  ;;  %s348_s1 = int_to_ptr.hbm [resolvable:$true] %s347_s1 }
  0x2d   : > { %1642 = dma.hbm_to_vmem [thread:$0]  (!%p2236_p13), %s348_s1, 1024, %s350_s24, [#allocation12], %s2078_s11, %s2078_s11, %s2079_s12  }
  0x2e   : > { %p38_p0 = scmp.ge.s32.totalorder %s37_s2, 2  ;;  %s40_s28 = sadd.s32 1, %s2071_s22 }
  0x2f   : > { %s47_s10 = sadd.s32 1, %s2055_s18  ;;  %p54_p2 = scmp.ne.s32.totalorder %s2055_s18, %s2051_s17 }
  0x30   : > { %s2534_s2 = smov (%p38_p0, %s37_s2), 0  ;;  %s2536_s28 = smov (!%p38_p0, %s40_s28), %s2071_s22 }
  0x31   : > { %2511 = sst [smem:[#allocation24_spill]] %s2534_s2  ;;  %p55_p3 = scmp.eq.s32.totalorder %s2075_s23, 0 }
  0x32   : > { %s260_s7 = ssub.s32 %s2067_s21, %s2534_s2  ;;  %p42_p5 = scmp.ge.s32.totalorder %s2536_s28, 2 }
  0x33   : > { %s264_s29 = sadd.s32 1, %s2043_s15  ;;  %p2269_p7 = por %p55_p3, %p54_p2 }
  0x34   : > { %p1655_p8 = scmp.lt.s32.totalorder %s2075_s23, 4  ;;  %s2538_s28 = smov (%p42_p5, %s2536_s28), 0 }
  0x35   : > { %2513 = sst [smem:[#allocation25_spill]] %s2538_s28  ;;  %s372_s11 = sand.u32 1, %s2055_s18  }
  0x36   : > { %s1559_s12 = sshll.u32 %s2071_s22, 4  ;;  %s44_s16 = ssub.s32 %s2071_s22, %s2538_s28 }
  0x37   : > { %p45_p9 = scmp.eq.s32.totalorder %s44_s16, 0  ;;  %s261_s25 = sor.u32 %s260_s7, %s44_s16 }
  0x38   : > { %p262_p12 = scmp.eq.s32.totalorder %s261_s25, 0  ;;  %s1374_s1 = sshll.u32 %s372_s11, 4 }
  0x39   : > { %s2281_s20 = scalar_select %p45_p9, %s2055_s18, %s47_s10  }
  0x3a   : > { %s2284_s24 = scalar_select %p262_p12, %s2043_s15, %s264_s29  }
  0x3b   : > { %s381_s6 = scalar_lea.hbm %s2469_s0, %s1559_s12  ;;  %s376_s21 = scalar_lea.vmem [#allocation5], %s1374_s1 }
  0x3c   : > { %s382_s2 = sshll.u32 %s381_s6, 4  ;;  %s384_s5 = sshll.u32 %s376_s21, 4  ;;  %s383_s2 = int_to_ptr.hbm [resolvable:$true] %s382_s2  ;;  %s385_s5 = int_to_ptr.vmem [resolvable:$true] %s384_s5 }
  0x3d   : > { %p1644_p13 = pnand %p1655_p8, %p2269_p7  ;;  %s373_s28 = scalar_lea.sflag [#allocation6], %s372_s11 }
  0x3e   : > { %s2083_s7 = smov 128   ;;  %s2084_s16 = smov 8  }
  0x3f   : > { %1646 = dma.hbm_to_vmem [thread:$0]  (!%p1644_p13), %s383_s2, 256, %s385_s5, %s373_s28, %s2083_s7, %s2083_s7, %s2084_s16  }
  0x40   : > { %396 = sbr.rel (%p2225_p11) target bundleno = 2244 (0x8c4), region = 60  ;;  %s398_s10 = sand.u32 (!%p2225_p11), 1, %s2051_s17  }
  0x41   : > { %s1378_s3 = sshll.u32 (!%p2225_p11), %s398_s10, 4  ;;  %s399_s4 = scalar_lea.sflag (!%p2225_p11), [#allocation6], %s398_s10 }
  0x42   : > { %s2296_s6 = scalar_lea.vmem (!%p2225_p11), [#allocation5], %s1378_s3 }
  0x45   : > { %2018 = dma.done.wait (%p2209_p4), %s399_s4, 256  }
  0x46   : > { %2020 = vsyncadd (%p2209_p4), %s399_s4, 4294967040 }
  0x47   : > { %2022 = dma.done.wait (%p2201_p1), [#allocation9], 2048  }
  0x48   : > { %2024 = vsyncadd (%p2201_p1), [#allocation9], 4294965248 }
  0x49   : > { %2026 = dma.done.wait (%p2201_p1), [#allocation12], 2048  }
  0x4a   : > { %2028 = vsyncadd (%p2201_p1), [#allocation12], 4294965248  ;;  %s457_s5 = sand.u32 1, %s2039_s14   ;;  %p1384_p4 = scmp.ne.s32.totalorder %s2059_s19, 0 }
  0x4b   : > { %s2313_s21 = sshll.u32 %s457_s5, 3  ;;  %s2514_s11 = sld [smem:[#allocation30_spill]] (!%p1384_p4) }
  0x4c   : > { %s459_s27 = scalar_lea.vmem [#allocation14], %s2313_s21  ;;  %464 = sbr.rel (%p1384_p4) target bundleno = 497 (0x1f1), region = 84 }
  0x51   : > { %v465_v0 = vld [vmem:[%s2296_s6] sm:$0xff]  ;;  %v466_v1 = vld [vmem:[%s2296_s6 + $0x8] sm:$0xff]  ;;  %v2085_v2 = vmov 128.0  }
  0x52   : > { %469 = vadd.xlane.f32.xlu0 %v465_v0  ;;  %1765 = vrcp.f32 %v2085_v2  ;;  %v1567_v17 = vld [vmem:[#allocation10 + $0x38] sm:$0xff]  ;;  %v1566_v19 = vld [vmem:[#allocation10 + $0x30] sm:$0xff]  ;;  %v1565_v21 = vld [vmem:[#allocation10 + $0x28] sm:$0xff] }
  0x53   : > { %v1575_v18 = vld [vmem:[#allocation11 + $0x38] sm:$0xff]  ;;  %591 = vmatpush.bf16.msra.mxu0 %v1567_v17  ;;  %v1574_v20 = vld [vmem:[#allocation11 + $0x30] sm:$0xff]  ;;  %v1573_v22 = vld [vmem:[#allocation11 + $0x28] sm:$0xff] }
  0x54   : > { %677 = vmatpush.bf16.msra.mxu1 %v1575_v18  ;;  %v1564_v23 = vld [vmem:[#allocation10 + $0x20] sm:$0xff]  ;;  %v1563_v25 = vld [vmem:[#allocation10 + $0x18] sm:$0xff]  ;;  %v1562_v27 = vld [vmem:[#allocation10 + $0x10] sm:$0xff] }
  0x55   : > { %v1572_v24 = vld [vmem:[#allocation11 + $0x20] sm:$0xff]  ;;  %v1571_v26 = vld [vmem:[#allocation11 + $0x18] sm:$0xff]  ;;  %v1570_v28 = vld [vmem:[#allocation11 + $0x10] sm:$0xff] }
  0x56   : > { %v1561_v29 = vld [vmem:[#allocation10 + $0x8] sm:$0xff]  ;;  %v1560_v32 = vld [vmem:[#allocation10] sm:$0xff] }
  0x57   : > { %592 = vmatpush.bf16.msra.mxu0 %v1566_v19  ;;  %v1569_v30 = vld [vmem:[#allocation11 + $0x8] sm:$0xff]  ;;  %v1568_v33 = vld [vmem:[#allocation11] sm:$0xff] }
  0x58   : > { %v1766_v3 = vpop.eup %1765  ;;  %678 = vmatpush.bf16.msra.mxu1 %v1574_v20  ;;  %v1762_v52 = vld [vmem:[%s2477_s8] ss:$0 sm:$0xff] }
  0x59   : > { %v474_v4 = vmul.f32 128.0, %v1766_v3  ;;  %vm478_vm0 = vweird.f32 %v1766_v3  ;;  %v1763_v57 = vld [vmem:[%s2478_s9] ss:$0 sm:$0xff] }
  0x5a   : > { %471 = vadd.xlane.f32.xlu0 %v466_v1 }
  0x5b   : > { %v475_v5 = vsub.f32 1.0, %v474_v4  ;;  %593 = vmatpush.bf16.msra.mxu0 %v1565_v21 }
  0x5c   : > { %679 = vmatpush.bf16.msra.mxu1 %v1573_v22 }
  0x5d   : > { %v476_v6 = vmul.f32 %v1766_v3, %v475_v5 }
  0x5f   : > { %v477_v7 = vadd.f32 %v1766_v3, %v476_v6  ;;  %594 = vmatpush.bf16.msra.mxu0 %v1564_v23 }
  0x60   : > { %680 = vmatpush.bf16.msra.mxu1 %v1572_v24 }
  0x61   : > { %v479_v8 = vsel %vm478_vm0, %v1766_v3, %v477_v7 }
  0x63   : > { %595 = vmatpush.bf16.msra.mxu0 %v1563_v25 }
  0x64   : > { %681 = vmatpush.bf16.msra.mxu1 %v1571_v26 }
  0x67   : > { %596 = vmatpush.bf16.msra.mxu0 %v1562_v27 }
  0x68   : > { %682 = vmatpush.bf16.msra.mxu1 %v1570_v28 }
  0x6b   : > { %597 = vmatpush.bf16.msra.mxu0 %v1561_v29 }
  0x6c   : > { %683 = vmatpush.bf16.msra.mxu1 %v1569_v30 }
  0x6f   : > { %598 = vmatpush.bf16.msra.mxu0 %v1560_v32 }
  0x70   : > { %684 = vmatpush.bf16.msra.mxu1 %v1568_v33 }
  0xc5   : > { %v470_v9 = vpop.xlane.xlu0 %469 }
  0xc6   : > { %v480_v10 = vmul.f32 %v479_v8, %v470_v9 }
  0xc8   : > { %v2319_v11 = vsub.f32 %v465_v0, %v480_v10  ;;  %v1764_v0 = vld [vmem:[%s2514_s11] ss:$0 sm:$0xff] }
  0xca   : > { %v484_v12 = vmul.f32 %v2319_v11, %v2319_v11 }
  0xcc   : > { %486 = vadd.xlane.f32.xlu1 %v484_v12 }
  0xcd   : > { %v472_v13 = vpop.xlane.xlu0 %471 }
  0xce   : > { %v481_v14 = vmul.f32 %v479_v8, %v472_v13 }
  0xd0   : > { %v2323_v15 = vsub.f32 %v466_v1, %v481_v14 }
  0xd2   : > { %v485_v16 = vmul.f32 %v2323_v15, %v2323_v15 }
  0xd4   : > { %488 = vadd.xlane.f32.xlu1 %v485_v16 }
 0x13f   : > { %v487_v31 = vpop.xlane.xlu1 %486 }
 0x140   : > { %v490_v34 = vmul.f32 %v487_v31, %v479_v8 }
 0x142   : > { %v492_v35 = vadd.f32 1e-05, %v490_v34 }
 0x144   : > { %1767 = vrsqrt.f32 %v492_v35  ;;  %vm500_vm2 = vweird.f32 %v492_v35 }
 0x147   : > { %v489_v36 = vpop.xlane.xlu1 %488 }
 0x148   : > { %v491_v37 = vmul.f32 %v489_v36, %v479_v8 }
 0x14a   : > { %v1768_v38 = vpop.eup %1767  ;;  %v493_v39 = vadd.f32 1e-05, %v491_v37 }
 0x14b   : > { %v495_v40 = vmul.f32 %v1768_v38, %v492_v35  ;;  %vm501_vm1 = vweird.f32 %v1768_v38 }
 0x14c   : > { %1769 = vrsqrt.f32 %v493_v39  ;;  %vm502_vm3 = vmor %vm500_vm2, %vm501_vm1  ;;  %vm510_vm5 = vweird.f32 %v493_v39 }
 0x14d   : > { %v496_v41 = vmul.f32 %v1768_v38, %v495_v40 }
 0x14f   : > { %v497_v42 = vmul.f32 0.5, %v496_v41 }
 0x151   : > { %v498_v43 = vsub.f32 1.5, %v497_v42 }
 0x152   : > { %v1770_v44 = vpop.eup %1769 }
 0x153   : > { %v499_v45 = vmul.f32 %v1768_v38, %v498_v43  ;;  %v505_v46 = vmul.f32 %v1770_v44, %v493_v39  ;;  %vm511_vm4 = vweird.f32 %v1770_v44 }
 0x154   : > { %vm512_vm6 = vmor %vm510_vm5, %vm511_vm4 }
 0x155   : > { %v506_v47 = vmul.f32 %v1770_v44, %v505_v46  ;;  %v503_v49 = vsel %vm502_vm3, %v1768_v38, %v499_v45 }
 0x156   : > { %v514_v51 = vmul.f32 %v503_v49, %v2319_v11 }
 0x157   : > { %v507_v48 = vmul.f32 0.5, %v506_v47 }
 0x158   : > { %v519_v56 = vmul.f32 %v1762_v52, %v514_v51 }
 0x159   : > { %v508_v50 = vsub.f32 1.5, %v507_v48 }
 0x15a   : > { %v524_v59 = vadd.f32 %v1763_v57, %v519_v56 }
 0x15b   : > { %v509_v53 = vmul.f32 %v1770_v44, %v508_v50 }
 0x15d   : > { %v513_v54 = vsel %vm512_vm6, %v1770_v44, %v509_v53 }
 0x15e   : > { %v515_v55 = vmul.f32 %v513_v54, %v2323_v15 }
 0x160   : > { %v520_v58 = vmul.f32 %v1762_v52, %v515_v55 }
 0x162   : > { %v525_v60 = vadd.f32 %v1763_v57, %v520_v58 }
 0x164   : > { %v526_v61 = vpack.c.bf16 %v525_v60, %v524_v59 }
 0x166   : > { %599 = vmatmul.bf16.vlgmr.msra.gmra.mxu0 %v526_v61  ;;  %685 = vmatmul.bf16.vlgmr.msra.gmra.mxu1 %v526_v61 }
 0x1e3   : > { %v600_v62 = vpop.f32.mrf.mxu0  ;;  %v686_v63 = vpop.f32.mrf.mxu1 }
 0x1e4   : > { %v687_v3 = vadd.f32 %v1764_v0, %v686_v63 }
 0x1eb   : > { %v602_v1 = vpop.f32.mrf.mxu0  ;;  %v688_v2 = vpop.f32.mrf.mxu1 }
 0x1ec   : > { %v1603_v4 = vpack.c.bf16 %v602_v1, %v600_v62  ;;  %v689_v5 = vadd.f32 %v1764_v0, %v688_v2 }
 0x1ee   : > { %1604 = vst [vmem:[#allocation2] sm:$0xff] %v1603_v4   ;;  %v1608_v6 = vpack.c.bf16 %v689_v5, %v687_v3 }
 0x1f0   : > { %1609 = vst [vmem:[#allocation3] sm:$0xff] %v1608_v6  }
 0x1f1 PF: > { %s1449_s12 = sshll.u32 %s2059_s19, 3  ;;  %v2086_v8 = vmov 128.0   ;;  %v1583_v9 = vld [vmem:[#allocation8 + $0x38] sm:$0xff]  ;;  %v1582_v20 = vld [vmem:[#allocation8 + $0x30] sm:$0xff]  ;;  %v1581_v21 = vld [vmem:[#allocation8 + $0x28] sm:$0xff]  ;;  %s2087_s1 = smov 96   ;;  %v819_v56 = vlaneseq }
 0x1f2   : > { %s696_s25 = scalar_lea.vmem %s2296_s6, %s1449_s12 [#allocation5]  ;;  %1775 = vrcp.f32 %v2086_v8  ;;  %804 = vmatpush.bf16.msra.mxu0 %v1583_v9  ;;  %v1580_v22 = vld [vmem:[#allocation8 + $0x20] sm:$0xff]  ;;  %v1579_v23 = vld [vmem:[#allocation8 + $0x18] sm:$0xff]  ;;  %v1578_v24 = vld [vmem:[#allocation8 + $0x10] sm:$0xff]  ;;  %vm835_vm11 = vcmask 261120   ;;  %s2515_s26 = sld [smem:[#allocation27_spill]]  ;;  %v821_v58 = vstv %s1449_s12  ;;  %vm856_vm13 = vcmask 130048  }
 0x1f3   : > { %v2342_v7 = vld [vmem:[%s696_s25] sm:$0xff]  ;;  %v1576_v26 = vld [vmem:[#allocation8] sm:$0xff]  ;;  %v820_v57 = vshrl.u32 %v819_v56, 7  ;;  %v2365_v61 = vand.u32 127, %v819_v56  ;;  %s2088_s30 = smov 32   ;;  %s2089_s2 = smov 64  }
 0x1f4   : > { %700 = vadd.xlane.f32.xlu0 %v2342_v7  ;;  %v1577_v25 = vld [vmem:[#allocation8 + $0x8] sm:$0xff]  ;;  %vm896_vm14 = vcmask 257024   ;;  %vm979_vm15 = vcmask 519424   ;;  %s2516_s28 = sld [smem:[#allocation20_spill]]  ;;  %vm1059_vm0 = vcmask 781824   ;;  %vm1139_vm1 = vcmask 1044224  }
 0x1f5   : > { %v1586_v27 = vld [vmem:[#allocation2] sm:$0xff]  ;;  %v2362_v60 = vadd.s32 %v821_v58, %v820_v57  ;;  %s2519_s3 = sld [smem:[#allocation33_spill]]  ;;  %s1240_s6 = sshll.u32 %s459_s27, 4  ;;  %s1241_s6 = int_to_ptr.vmem [resolvable:$true] %s1240_s6 }
 0x1f6   : > { %805 = vmatpush.bf16.msra.mxu0 %v1582_v20  ;;  %912 = vrot.lane.b32.xlu1 %v1586_v27, %s2087_s1  ;;  %v1771_v37 = vld [vmem:[%s2477_s8] ss:$0 sm:$0xff] }
 0x1f7   : > { %v1772_v40 = vld [vmem:[%s2478_s9] ss:$0 sm:$0xff]  ;;  %vm825_vm12 = vcmp.gt.s32.totalorder %v2365_v61, %v2362_v60 }
 0x1f8   : > { %v1776_v10 = vpop.eup %1775  ;;  %v1584_v44 = vld [vmem:[#allocation2] sm:$0xff] }
 0x1f9   : > { %v703_v11 = vmul.f32 128.0, %v1776_v10  ;;  %vm707_vm7 = vweird.f32 %v1776_v10  ;;  %v840_v45 = vsel %vm835_vm11, %v1584_v44, 0  ;;  %v1773_v48 = vld [vmem:[%s2515_s26] ss:$0 sm:$0xff] }
 0x1fa   : > { %806 = vmatpush.bf16.msra.mxu0 %v1581_v21  ;;  %849 = vmatpush.bf16.xpose.msra.mxu1 %v840_v45  ;;  %s1555_s29 = sshll.u32 %s2516_s28, 1 }
 0x1fb   : > { %v704_v12 = vsub.f32 1.0, %v703_v11  ;;  %s1236_s13 = sadd.s32 %s2059_s19, %s1555_s29  ;;  %s1226_s19 = scalar_lea.sflag [#allocation7], %s457_s5 }
 0x1fc   : > { %s1556_s11 = sshll.u32 %s1236_s13, 3  ;;  %s1965_s13 = scalar_lea.hbm %s2519_s3, 32 }
 0x1fd   : > { %v705_v13 = vmul.f32 %v1776_v10, %v704_v12  ;;  %s1238_s4 = scalar_lea.hbm %s2519_s3, %s1556_s11 }
 0x1fe   : > { %807 = vmatpush.bf16.msra.mxu0 %v1580_v22  ;;  %s1242_s26 = sshll.u32 %s1238_s4, 4  ;;  %s1243_s26 = int_to_ptr.hbm [resolvable:$true] %s1242_s26 }
 0x1ff   : > { %v706_v14 = vadd.f32 %v1776_v10, %v705_v13 }
 0x201   : > { %v708_v15 = vsel %vm707_vm7, %v1776_v10, %v706_v14 }
 0x202   : > { %808 = vmatpush.bf16.msra.mxu0 %v1579_v23 }
 0x206   : > { %809 = vmatpush.bf16.msra.mxu0 %v1578_v24 }
 0x20a   : > { %810 = vmatpush.bf16.msra.mxu0 %v1577_v25 }
 0x20e   : > { %811 = vmatpush.bf16.msra.mxu0 %v1576_v26 }
 0x267   : > { %v701_v16 = vpop.xlane.xlu0 %700 }
 0x268   : > { %v709_v17 = vmul.f32 %v708_v15, %v701_v16  ;;  %v913_v46 = vpop.permute.xlu1 %912  ;;  %v1587_v16 = vld [vmem:[#allocation3] sm:$0xff] }
 0x269   : > { %v918_v47 = vsel %vm835_vm11, %v913_v46, 0 }
 0x26a   : > { %v710_v18 = vsub.f32 %v2342_v7, %v709_v17  ;;  %927 = vmatpush.bf16.xpose.msrb.mxu0 %v918_v47  ;;  %v1590_v17 = vld [vmem:[#allocation2] sm:$0xff] }
 0x26c   : > { %v711_v19 = vmul.f32 %v710_v18, %v710_v18 }
 0x26e   : > { %712 = vadd.xlane.f32.xlu0 %v711_v19  ;;  %v1585_v19 = vld [vmem:[#allocation3] sm:$0xff] }
 0x26f   : > { %889 = vmatpush.bf16.msra.mxu2 %v1585_v19 }
 0x2e1   : > { %v713_v28 = vpop.xlane.xlu0 %712 }
 0x2e2   : > { %v714_v29 = vmul.f32 %v713_v28, %v708_v15 }
 0x2e4   : > { %v715_v30 = vadd.f32 1e-05, %v714_v29 }
 0x2e6   : > { %1777 = vrsqrt.f32 %v715_v30  ;;  %vm722_vm9 = vweird.f32 %v715_v30 }
 0x2ec   : > { %v1778_v31 = vpop.eup %1777 }
 0x2ed   : > { %v717_v32 = vmul.f32 %v1778_v31, %v715_v30  ;;  %vm723_vm8 = vweird.f32 %v1778_v31 }
 0x2ee   : > { %vm724_vm10 = vmor %vm722_vm9, %vm723_vm8 }
 0x2ef   : > { %v718_v33 = vmul.f32 %v1778_v31, %v717_v32 }
 0x2f1   : > { %v719_v34 = vmul.f32 0.5, %v718_v33 }
 0x2f3   : > { %v720_v35 = vsub.f32 1.5, %v719_v34 }
 0x2f5   : > { %v721_v36 = vmul.f32 %v1778_v31, %v720_v35 }
 0x2f7   : > { %v725_v38 = vsel %vm724_vm10, %v1778_v31, %v721_v36 }
 0x2f8   : > { %v726_v39 = vmul.f32 %v725_v38, %v710_v18  ;;  %v1588_v18 = vld [vmem:[#allocation2] sm:$0xff] }
 0x2fa   : > { %v730_v41 = vmul.f32 %v1771_v37, %v726_v39 }
 0x2fc   : > { %v734_v42 = vadd.f32 %v1772_v40, %v730_v41 }
 0x2fe   : > { %v735_v43 = vpack.c.bf16 %v734_v42, %v734_v42 }
 0x300   : > { %812 = vmatmul.bf16.vlgmr.msra.gmra.mxu0 %v735_v43 }
 0x37d   : > { %v813_v49 = vpop.f32.mrf.mxu0 }
 0x37e   : > { %v814_v50 = vadd.f32 %v1773_v48, %v813_v49 }
 0x380   : > { %v817_v51 = vmul.f32 0.17677669, %v814_v50 }
 0x382   : > { %v818_v52 = vpack.c.bf16 %v817_v51, %v817_v51 }
 0x384   : > { %v903_v53 = vunpack.c.l.b16 %v818_v52  ;;  %1486 = vmatmul.msk.bf16.vlgmr.msra.gmra.mxu1 %vm835_vm11, %v818_v52 }
 0x385   : > { %v815_v54 = vpop.f32.mrf.mxu0 }
 0x386   : > { %v904_v55 = vpack.c.b16 %v903_v53, %v903_v53 }
 0x388   : > { %905 = vrot.lane.b32.xlu1 %v904_v55, %s2087_s1 }
 0x3fa   : > { %v906_v59 = vpop.permute.xlu1 %905 }
 0x3fb   : > { %1496 = vmatmul.msk.bf16.vlgmr.msrb.gmra.mxu0 %vm835_vm11, %v906_v59 }
 0x401   : > { %v851_v62 = vpop.f32.mrf.mxu1 }
 0x402   : > { %v855_v63 = vsel %vm825_vm12, -1e+09, %v851_v62 }
 0x403   : > { %v857_v0 = vsel %vm856_vm13, %v855_v63, -inf }
 0x404   : > { %858 = vmax.xlane.f32.xlu2 %v857_v0 }
 0x409   : > { %v853_v1 = vpop.f32.mrf.mxu1 }
 0x477   : > { %v859_v2 = vpop.xlane.xlu2 %858 }
 0x478   : > { %v860_v3 = vsub.f32 %v855_v63, %v859_v2  ;;  %v929_v4 = vpop.f32.mrf.mxu0 }
 0x479   : > { %v933_v5 = vsel %vm825_vm12, -1e+09, %v929_v4 }
 0x47a   : > { %v861_v6 = vpack.c.bf16 %v860_v3, %v860_v3  ;;  %v934_v8 = vsel %vm856_vm13, %v933_v5, -inf }
 0x47b   : > { %935 = vmax.xlane.f32.xlu2 %v934_v8 }
 0x47c   : > { %v862_v9 = vunpack.c.l.bf16 %v861_v6 }
 0x47e   : > { %v863_v10 = vmul.f32 1.442695, %v862_v9 }
 0x480   : > { %1779 = vpow2.f32 %v863_v10  ;;  %v931_v11 = vpop.f32.mrf.mxu0 }
 0x486   : > { %v1780_v12 = vpop.eup %1779 }
 0x487   : > { %v865_v13 = vpack.c.bf16 %v1780_v12, %v1780_v12 }
 0x489   : > { %v866_v14 = vunpack.c.l.bf16 %v865_v13 }
 0x48b   : > { %v867_v15 = vsel %vm856_vm13, %v866_v14, 0.0 }
 0x48c   : > { %868 = vadd.xlane.f32.xlu0 %v867_v15  ;;  %v1589_v15 = vld [vmem:[#allocation3] sm:$0xff] }
 0x493   : > { %955 = vrot.lane.b32.xlu2 %v1587_v16, %s2087_s1 }
 0x49b   : > { %1072 = vrot.lane.b32.xlu2 %v1590_v17, %s2088_s30 }
 0x4a0   : > { %992 = vrot.lane.b32.xlu0 %v1588_v18, %s2089_s2 }
 0x4a3   : > { %1065 = vrot.lane.b32.xlu2 %v904_v55, %s2088_s30 }
 0x4a8   : > { %985 = vrot.lane.b32.xlu0 %v904_v55, %s2089_s2 }
 0x4ee   : > { %v936_v20 = vpop.xlane.xlu2 %935 }
 0x4ef   : > { %v937_v21 = vsub.f32 %v933_v5, %v936_v20  ;;  %v1591_v5 = vld [vmem:[#allocation3] sm:$0xff] }
 0x4f1   : > { %v938_v22 = vpack.c.bf16 %v937_v21, %v937_v21 }
 0x4f3   : > { %v939_v23 = vunpack.c.l.bf16 %v938_v22 }
 0x4f5   : > { %v940_v24 = vmul.f32 1.442695, %v939_v23 }
 0x4f6   : > { %v956_v25 = vpop.permute.xlu2 %955 }
 0x4f7   : > { %1781 = vpow2.f32 %v940_v24  ;;  %968 = vmatpush.bf16.msrb.mxu2 %v956_v25 }
 0x4fd   : > { %v1782_v26 = vpop.eup %1781 }
 0x4fe   : > { %v942_v27 = vpack.c.bf16 %v1782_v26, %v1782_v26  ;;  %v1073_v33 = vpop.permute.xlu2 %1072 }
 0x4ff   : > { %v869_v28 = vpop.xlane.xlu0 %868  ;;  %v1078_v34 = vsel %vm835_vm11, %v1073_v33, 0 }
 0x500   : > { %1783 = vrcp.f32 %v869_v28  ;;  %v943_v29 = vunpack.c.l.bf16 %v942_v27  ;;  %v1599_v27 = vld [vmem:[#allocation13 + $0x38] sm:$0xff]  ;;  %v1598_v28 = vld [vmem:[#allocation13 + $0x30] sm:$0xff] }
 0x502   : > { %v944_v30 = vsel %vm856_vm13, %v943_v29, 0.0 }
 0x503   : > { %945 = vadd.xlane.f32.xlu1 %v944_v30 }
 0x506   : > { %v1784_v31 = vpop.eup %1783  ;;  %v1066_v45 = vpop.permute.xlu2 %1065 }
 0x507   : > { %v871_v32 = vmul.f32 %v1784_v31, %v866_v14  ;;  %v1596_v31 = vld [vmem:[#allocation13 + $0x20] sm:$0xff] }
 0x509   : > { %v872_v35 = vpack.c.bf16 %v871_v32, %v871_v32 }
 0x50b   : > { %1491 = vmatmul.msk.bf16.vlgmr.msra.gmra.mxu2 %vm856_vm13, %v872_v35 }
 0x50c   : > { %1087 = vmatpush.bf16.xpose.msra.mxu2 %v1078_v34 }
 0x512   : > { %v993_v36 = vpop.permute.xlu0 %992 }
 0x513   : > { %v998_v37 = vsel %vm835_vm11, %v993_v36, 0  ;;  %v1595_v36 = vld [vmem:[#allocation13 + $0x18] sm:$0xff] }
 0x514   : > { %1007 = vmatpush.bf16.xpose.msrb.mxu1 %v998_v37  ;;  %v1594_v37 = vld [vmem:[#allocation13 + $0x10] sm:$0xff] }
 0x51a   : > { %v986_v38 = vpop.permute.xlu0 %985 }
 0x51b   : > { %1506 = vmatmul.msk.bf16.vlgmr.msrb.gmra.mxu1 %vm835_vm11, %v986_v38  ;;  %v1593_v38 = vld [vmem:[#allocation13 + $0x8] sm:$0xff] }
 0x576   : > { %v946_v39 = vpop.xlane.xlu1 %945 }
 0x577   : > { %1785 = vrcp.f32 %v946_v39  ;;  %v1592_v39 = vld [vmem:[#allocation13] sm:$0xff] }
 0x57d   : > { %v1786_v40 = vpop.eup %1785 }
 0x57e   : > { %v948_v41 = vmul.f32 %v1786_v40, %v943_v29  ;;  %v1597_v29 = vld [vmem:[#allocation13 + $0x28] sm:$0xff] }
 0x580   : > { %v949_v42 = vpack.c.bf16 %v948_v41, %v948_v41 }
 0x582   : > { %1501 = vmatmul.msk.bf16.vlgmr.msrb.gmra.mxu2 %vm856_vm13, %v949_v42 }
 0x58e   : > { %v891_v43 = vpop.f32.mrf.mxu2 }
 0x58f   : > { %v895_v44 = vpack.c.bf16 %v891_v43, %v891_v43 }
 0x591   : > { %897 = vst.msk [vmem:[#allocation4] sm:$0xf] %vm896_vm14, %v895_v44 }
 0x592   : > { %1516 = vmatmul.msk.bf16.vlgmr.msra.gmra.mxu2 %vm835_vm11, %v1066_v45 }
 0x596   : > { %v893_v46 = vpop.f32.mrf.mxu2 }
 0x598   : > { %v1009_v47 = vpop.f32.mrf.mxu1 }
 0x599   : > { %v1013_v48 = vsel %vm825_vm12, -1e+09, %v1009_v47 }
 0x59a   : > { %v1014_v49 = vsel %vm856_vm13, %v1013_v48, -inf }
 0x59b   : > { %1015 = vmax.xlane.f32.xlu0 %v1014_v49 }
 0x5a0   : > { %v1011_v50 = vpop.f32.mrf.mxu1 }
 0x5af   : > { %1115 = vrot.lane.b32.xlu0 %v1591_v5, %s2088_s30 }
 0x605   : > { %v970_v51 = vpop.f32.mrf.mxu2 }
 0x606   : > { %v974_v4 = vpack.c.bf16 %v970_v51, %v970_v51 }
 0x60d   : > { %v972_v52 = vpop.f32.mrf.mxu2 }
 0x60e   : > { %v1016_v53 = vpop.xlane.xlu0 %1015 }
 0x60f   : > { %v1017_v54 = vsub.f32 %v1013_v48, %v1016_v53 }
 0x611   : > { %v1018_v55 = vpack.c.bf16 %v1017_v54, %v1017_v54 }
 0x613   : > { %v1019_v56 = vunpack.c.l.bf16 %v1018_v55 }
 0x615   : > { %v1020_v57 = vmul.f32 1.442695, %v1019_v56  ;;  %v1089_v58 = vpop.f32.mrf.mxu2 }
 0x616   : > { %v1093_v59 = vsel %vm825_vm12, -1e+09, %v1089_v58 }
 0x617   : > { %1787 = vpow2.f32 %v1020_v57  ;;  %v1094_v62 = vsel %vm856_vm13, %v1093_v59, -inf }
 0x618   : > { %1095 = vmax.xlane.f32.xlu2 %v1094_v62 }
 0x61d   : > { %v1788_v63 = vpop.eup %1787  ;;  %v1091_v0 = vpop.f32.mrf.mxu2 }
 0x61e   : > { %v1022_v1 = vpack.c.bf16 %v1788_v63, %v1788_v63 }
 0x620   : > { %v1023_v2 = vunpack.c.l.bf16 %v1022_v1 }
 0x621   : > { %v1116_v16 = vpop.permute.xlu0 %1115 }
 0x622   : > { %v1024_v3 = vsel %vm856_vm13, %v1023_v2, 0.0  ;;  %1128 = vmatpush.bf16.msra.mxu1 %v1116_v16 }
 0x623   : > { %1025 = vadd.xlane.f32.xlu1 %v1024_v3 }
 0x630   : > { %976 = vrot.lane.b32.xlu2 %v974_v4, %s2088_s30  ;;  %s1959_s30 = sshra.s32 %s1243_s26, 4  ;;  %s1960_s30 = int_to_ptr.hbm [resolvable:$true] %s1959_s30 }
 0x631   : > { %p1966_p2 = scmp.lt.s32.totalorder %s1960_s30, %s2519_s3 }
 0x68b   : > { %v1096_v6 = vpop.xlane.xlu2 %1095 }
 0x68c   : > { %v1097_v60 = vsub.f32 %v1093_v59, %v1096_v6 }
 0x68e   : > { %v1098_v61 = vpack.c.bf16 %v1097_v60, %v1097_v60 }
 0x690   : > { %v1099_v8 = vunpack.c.l.bf16 %v1098_v61 }
 0x692   : > { %v1100_v9 = vmul.f32 1.442695, %v1099_v8 }
 0x693   : > { %v977_v10 = vpop.permute.xlu2 %976 }
 0x694   : > { %1789 = vpow2.f32 %v1100_v9  ;;  %980 = vst.msk [vmem:[#allocation4] sm:$0xf] %vm979_vm15, %v977_v10 }
 0x696   : > { %v1026_v17 = vpop.xlane.xlu1 %1025 }
 0x69a   : > { %v1790_v11 = vpop.eup %1789 }
 0x69b   : > { %v1102_v12 = vpack.c.bf16 %v1790_v11, %v1790_v11 }
 0x69d   : > { %v1103_v13 = vunpack.c.l.bf16 %v1102_v12 }
 0x69f   : > { %v1104_v14 = vsel %vm856_vm13, %v1103_v13, 0.0 }
 0x6a0   : > { %1105 = vadd.xlane.f32.xlu1 %v1104_v14 }
 0x6b9   : > { %1035 = vrot.lane.b32.xlu1 %v1589_v15, %s2089_s2 }
 0x713   : > { %v1106_v18 = vpop.xlane.xlu1 %1105 }
 0x714   : > { %1791 = vrcp.f32 %v1106_v18 }
 0x715   : > { %1793 = vrcp.f32 %v1026_v17 }
 0x71a   : > { %v1792_v19 = vpop.eup %1791 }
 0x71b   : > { %v1108_v20 = vmul.f32 %v1792_v19, %v1103_v13  ;;  %v1794_v22 = vpop.eup %1793 }
 0x71c   : > { %v1028_v23 = vmul.f32 %v1794_v22, %v1023_v2 }
 0x71d   : > { %v1109_v21 = vpack.c.bf16 %v1108_v20, %v1108_v20 }
 0x71e   : > { %v1029_v25 = vpack.c.bf16 %v1028_v23, %v1028_v23 }
 0x71f   : > { %1521 = vmatmul.msk.bf16.vlgmr.msra.gmra.mxu1 %vm856_vm13, %v1109_v21 }
 0x72b   : > { %v1036_v24 = vpop.permute.xlu1 %1035 }
 0x72c   : > { %1048 = vmatpush.bf16.msra.mxu3 %v1036_v24 }
 0x72f   : > { %1511 = vmatmul.msk.bf16.vlgmr.msra.gmra.mxu3 %vm856_vm13, %v1029_v25 }
 0x730   : > { %1210 = vmatpush.bf16.msrb.mxu3 %v1599_v27 }
 0x734   : > { %1211 = vmatpush.bf16.msrb.mxu3 %v1598_v28 }
 0x738   : > { %1212 = vmatpush.bf16.msrb.mxu3 %v1597_v29 }
 0x73c   : > { %1213 = vmatpush.bf16.msrb.mxu3 %v1596_v31 }
 0x740   : > { %1214 = vmatpush.bf16.msrb.mxu3 %v1595_v36 }
 0x744   : > { %1215 = vmatpush.bf16.msrb.mxu3 %v1594_v37 }
 0x748   : > { %1216 = vmatpush.bf16.msrb.mxu3 %v1593_v38 }
 0x74c   : > { %1217 = vmatpush.bf16.msrb.mxu3 %v1592_v39 }
 0x79c   : > { %v1130_v26 = vpop.f32.mrf.mxu1 }
 0x79d   : > { %v1134_v35 = vpack.c.bf16 %v1130_v26, %v1130_v26 }
 0x7a4   : > { %v1132_v30 = vpop.f32.mrf.mxu1 }
 0x7b2   : > { %v1050_v32 = vpop.f32.mrf.mxu3 }
 0x7b3   : > { %v1054_v33 = vpack.c.bf16 %v1050_v32, %v1050_v32 }
 0x7b5   : > { %1056 = vrot.lane.b32.xlu1 %v1054_v33, %s2089_s2  ;;  %s1961_s2 = scalar_lea.hbm %s1960_s30, 8 }
 0x7b6   : > { %p1962_p1 = scmp.ne.s32.totalorder %s1960_s30, %s1961_s2  ;;  %p1967_p3 = scmp.lt.s32.totalorder %s1965_s13, %s1961_s2 }
 0x7b8   : > { %p1963_p11 = pnand %p1962_p1, %p2215_p6  ;;  %p1968_p5 = por %p1967_p3, %p1966_p2 }
 0x7ba   : > { %v1052_v34 = vpop.f32.mrf.mxu3  ;;  %p1964_p0 = pneg %p1963_p11 }
 0x7bc   : > { %p1969_p7 = pnand %p1968_p5, %p1964_p0 }
 0x7bd   : > { %1136 = vrot.lane.b32.xlu1 %v1134_v35, %s2087_s1  ;;  %s2517_s1 = sld [smem:[#allocation32_spill]] }
 0x7c3   : > { %v1774_v43 = vld [vmem:[%s2517_s1] ss:$0 sm:$0xff] }
 0x827   : > { %v1057_v40 = vpop.permute.xlu1 %1056 }
 0x828   : > { %1060 = vst.msk [vmem:[#allocation4] sm:$0xf] %vm1059_vm0, %v1057_v40 }
 0x82f   : > { %v1137_v41 = vpop.permute.xlu1 %1136 }
 0x830   : > { %1140 = vst.msk [vmem:[#allocation4] sm:$0xf] %vm1139_vm1, %v1137_v41 }
 0x837   : > { %v1141_v42 = vld [vmem:[#allocation4] sm:$0xf] }
 0x838   : > { %1218 = vmatmul.bf16.vlgmr.msrb.gmra.mxu3 %v1141_v42 }
 0x8bb   : > { %v1219_v44 = vpop.f32.mrf.mxu3 }
 0x8bc   : > { %v1220_v45 = vadd.f32 %v1774_v43, %v1219_v44 }
 0x8be   : > { %v1223_v46 = vadd.f32 %v1220_v45, %v2342_v7 }
 0x8c0   : > { %1224 = vst [vmem:[%s459_s27] sm:$0xff] %v1223_v46 }
 0x8c1   : > { %1972 = shalt.err (!%p1969_p7)
}
 0x8c2   : > { %1628 = dma.vmem_to_hbm [thread:$0]  (%p2215_p6), %s1241_s6, 128, %s1243_s26, %s1226_s19  }
 0x8c3   : > { %v1221_v7 = vpop.f32.mrf.mxu3 }
 0x8c4 PF: > { %s2520_s5 = sld [smem:[#allocation19_spill]]  ;;  %p1660_p8 = scmp.ge.s32.totalorder %s2075_s23, 2 }
 0x8c6   : > { %p1648_p9 = pnand %p1660_p8, %p2221_p10 }
 0x8c8   : > { %p1649_p12 = pneg %p1648_p9 }
 0x8ca   : > { %s1254_s27 = sand.u32 1, %s2520_s5  }
 0x8cb   : > { %s1255_s25 = scalar_lea.sflag [#allocation7], %s1254_s27 }
 0x8cc   : > { %2030 = dma.done.wait (%p1649_p12), %s1255_s25, 128  }
 0x8cd   : > { %2032 = vsyncadd (%p1649_p12), %s1255_s25, 4294967168  ;;  %s28_s23 = sadd.s32 1, %s2075_s23   ;;  %s2522_s19 = sld [smem:[#allocation21_spill]] }
 0x8ce   : > { %p25_p13 = scmp.ge.s32.totalorder %s28_s23, 6   ;;  %s2523_s21 = sld [smem:[#allocation24_spill]] }
 0x8cf   : > { %s2524_s1 = sld [smem:[#allocation25_spill]]  ;;  %s2525_s13 = smov %s2039_s14 }
 0x8d0   : > { %s2526_s14 = smov %s2043_s15  ;;  %s2527_s15 = smov %s2284_s24 }
 0x8d1   : > { %s2528_s16 = smov %s2051_s17  ;;  %s2529_s17 = smov %s2055_s18 }
 0x8d2   : > { %s2530_s18 = smov %s2281_s20  ;;  %s2531_s20 = smov %s2071_s22 }
 0x8d3   :  { %27 = sbr.rel (!%p25_p13) target bundleno = 20 (0x14), region = 126 }
 0x8d5   : > { %s2532_s22 = smov %s2524_s1 }
 0x8d8   :  { %1261 = vsyncpa [#allocation6], 1 }
 0x8d9   :  { %1263 = vsyncpa [#allocation6 + $0x1], 1 }
 0x8da   :  { %1264 = vsyncpa [#allocation9], 1 }
 0x8db   :  { %1265 = vsyncpa [#allocation12], 1 }
 0x8dc   :  { %1266 = vsyncpa [#allocation7], 1 }
 0x8dd   :  { %1268 = vsyncpa [#allocation7 + $0x1], 1 }

</bundles_post_ra>
